<compile_context>
chip_gen: v7x
topology: tpu7x:2x2x1
jax: 0.10.0
libtpu: 0.0.40
codegen_flags: <defaults>
</compile_context>

<pallas_src>
import numpy as np
import jax
import jax.numpy as jnp
from jax.experimental import pallas as pl
from jax.experimental.pallas import tpu as pltpu

# ------------------------- model hyper-parameters --------------------------
H = 100          # true LSTM hidden size
HP = 128         # lane-padded hidden size used inside kernels (exact padding)
D_BERT = 768
D_PROJ = 100
MAX_SEQ_LEN = 128
WINDOW_PAST = 10
WINDOW_FUTURE = 10
VOCAB = 512

EDGE_TYPE_MAPPING = {}
for _j in range(2):
    for _k in range(2):
        EDGE_TYPE_MAPPING[str(_j) + str(_k) + '0'] = len(EDGE_TYPE_MAPPING)
        EDGE_TYPE_MAPPING[str(_j) + str(_k) + '1'] = len(EDGE_TYPE_MAPPING)


# ----------------------------- Pallas kernels ------------------------------

def _linear_kernel(x_ref, w_ref, b_ref, o_ref):
    # bf16 MXU operands, f32 accumulation; bias added in f32.
    o_ref[...] = (
        jnp.dot(x_ref[...].astype(jnp.bfloat16), w_ref[...],
                preferred_element_type=jnp.float32)
        + b_ref[...]
    ).astype(o_ref.dtype)


def pallas_linear(x, w, b=None):
    """y = x @ w + b ; x:(M,K) f32, w:(K,N) (cast to bf16), b:(N,) f32 or None."""
    x = x.astype(jnp.float32)
    M, K = x.shape
    K2, N = w.shape
    assert K == K2
    w = w.astype(jnp.bfloat16)
    if b is None:
        b = jnp.zeros((N,), jnp.float32)
    b2 = b.reshape(1, N).astype(jnp.float32)
    # Large row tiles: per-grid-step overhead is ~0.35us, and a (512, 768) f32
    # tile double-buffered is only ~3 MiB - far under scoped VMEM everywhere.
    tm = 512 if (M > 512 and M % 512 == 0) else M
    grid = (M // tm,)
    return pl.pallas_call(
        _linear_kernel,
        out_shape=jax.ShapeDtypeStruct((M, N), jnp.float32),
        grid=grid,
        in_specs=[
            pl.BlockSpec((tm, K), lambda i: (i, 0)),
            pl.BlockSpec((K, N), lambda i: (0, 0)),
            pl.BlockSpec((1, N), lambda i: (0, 0)),
        ],
        out_specs=pl.BlockSpec((tm, N), lambda i: (i, 0)),
        compiler_params=pltpu.CompilerParams(dimension_semantics=("parallel",)),
    )(x, w, b2)


def _lstm_layer_kernel(x_ref, wih_ref, whh_ref, b_ref, hs_ref, h_sc, c_sc):
    """One full direction of one LSTM layer (all T timesteps) per grid step.

    x_ref:   (T, B, Din)  f32   shared input sequence (lane-padded Din)
    wih_ref: (Din, 4*HP)  bf16  per-direction input->gates weights (VMEM-resident)
    whh_ref: (HP, 4*HP)   bf16  per-direction hidden->gates weights (VMEM-resident)
    b_ref:   (1, 4*HP)    f32   fused b_ih + b_hh (zero in padded lanes)
    hs_ref:  (T, B, HP)   f32   per-direction hidden-state sequence (output)
    h_sc, c_sc: (B, HP)   f32   recurrent state, kept in VMEM for the whole loop
    """
    d = pl.program_id(0)                 # 0 = forward in time, 1 = backward
    T = x_ref.shape[0]
    h_sc[...] = jnp.zeros_like(h_sc)
    c_sc[...] = jnp.zeros_like(c_sc)

    def step(t, carry):
        t_eff = jnp.where(d == 0, t, T - 1 - t)
        x_t = x_ref[t_eff]                                       # (B, Din) f32
        gates = (
            jnp.dot(x_t.astype(jnp.bfloat16), wih_ref[...],
                    preferred_element_type=jnp.float32)
            + jnp.dot(h_sc[...].astype(jnp.bfloat16), whh_ref[...],
                      preferred_element_type=jnp.float32)
            + b_ref[...])                                        # (B, 4*HP) f32
        i = jax.nn.sigmoid(gates[:, 0 * HP:1 * HP])
        f = jax.nn.sigmoid(gates[:, 1 * HP:2 * HP])
        g = jnp.tanh(gates[:, 2 * HP:3 * HP])
        o = jax.nn.sigmoid(gates[:, 3 * HP:4 * HP])
        c_new = f * c_sc[...] + i * g
        h_new = o * jnp.tanh(c_new)
        c_sc[...] = c_new
        h_sc[...] = h_new
        hs_ref[t_eff] = h_new
        return carry

    jax.lax.fori_loop(0, T, step, 0, unroll=True)


def pallas_lstm_layer(x, wih_all, whh_all, b_all):
    """Fused bidirectional LSTM layer: grid=(2,) over (forward, backward)."""
    T, B, Din = x.shape
    G = 4 * HP
    return pl.pallas_call(
        _lstm_layer_kernel,
        out_shape=jax.ShapeDtypeStruct((2, T, B, HP), jnp.float32),
        grid=(2,),
        in_specs=[
            pl.BlockSpec((T, B, Din), lambda d: (0, 0, 0)),      # shared sequence
            pl.BlockSpec((None, Din, G), lambda d: (d, 0, 0)),   # per-direction W_ih^T
            pl.BlockSpec((None, HP, G), lambda d: (d, 0, 0)),    # per-direction W_hh^T
            pl.BlockSpec((None, 1, G), lambda d: (d, 0, 0)),     # per-direction bias
        ],
        out_specs=pl.BlockSpec((None, T, B, HP), lambda d: (d, 0, 0, 0)),
        scratch_shapes=[pltpu.VMEM((B, HP), jnp.float32),        # h
                        pltpu.VMEM((B, HP), jnp.float32)],       # c
        compiler_params=pltpu.CompilerParams(
            dimension_semantics=("parallel",)),   # one direction per TensorCore on v7x
    )(x, wih_all, whh_all, b_all)


def _edge_attn_kernel(m_ref, w_ref, mask_ref, o_ref):
    """Fused MaskedEdgeAttention 'attn1' for one dialogue of the batch.

    m_ref:    (L, Dpad)        f32  mean-pooled utterance features (lane-padded)
    w_ref:    (Dpad, Q=128)    bf16 scalar projection (no bias)
    mask_ref: (L, Q)           f32  transposed edge mask (1 at edges, 0 else)
    o_ref:    (L, Q)           f32  transposed scores: o[l, q] == scores[q, l]

    Softmax (reference dim=0) and the masked renormalisation both reduce over L
    on the sublane axis; the 128-wide lane axis stays dense (unmasked stores).
    """
    scale = jnp.dot(m_ref[...].astype(jnp.bfloat16), w_ref[...],
                    preferred_element_type=jnp.float32)           # (L, Q)
    e = jnp.exp(scale - jnp.max(scale, axis=0, keepdims=True))
    alpha = e / jnp.sum(e, axis=0, keepdims=True)                 # softmax over L
    m = mask_ref[...]
    masked = alpha * (m + (1.0 - m) * 1e-10)
    sums = jnp.sum(masked, axis=0, keepdims=True)
    # Guard fully-masked columns (q >= seq_len): sums ~ 1e-10 there; the result
    # is zeroed by *m anyway, the maximum just keeps the reciprocal well-behaved.
    inv = pl.reciprocal(jnp.maximum(sums, 1e-30), approx=True)
    o_ref[...] = masked * inv * m


def pallas_edge_attention(m_bt, w_pad, mask_t):
    """m_bt:(B,L,Dpad), w_pad:(Dpad,128), mask_t:(B,L,128) -> scores_t (B,L,128)."""
    B, L, Dp = m_bt.shape
    Q = w_pad.shape[1]
    return pl.pallas_call(
        _edge_attn_kernel,
        out_shape=jax.ShapeDtypeStruct((B, L, Q), jnp.float32),
        grid=(B,),
        in_specs=[
            pl.BlockSpec((None, L, Dp), lambda b: (b, 0, 0)),
            pl.BlockSpec((Dp, Q), lambda b: (0, 0)),
            pl.BlockSpec((None, L, Q), lambda b: (b, 0, 0)),
        ],
        out_specs=pl.BlockSpec((None, L, Q), lambda b: (b, 0, 0)),
        compiler_params=pltpu.CompilerParams(dimension_semantics=("parallel",)),
    )(m_bt.astype(jnp.float32), w_pad.astype(jnp.bfloat16), mask_t.astype(jnp.float32))


# ------------------------------- LSTM glue ---------------------------------

def pad_lstm_dir_weights(w_ih, w_hh, b_ih, b_hh, din_pad, col_map):
    """Zero-pad the per-gate hidden dim H=100 -> HP=128 and relocate the input
    columns to 128-aligned offsets (col_map = [(src_lo, src_hi, dst_lo), ...]).

    Exactness: this padding is exact only because h0 = c0 = 0 and the padded
    bias lanes are zero -> padded gate channels see gates == 0, i.e. i=f=o=0.5,
    g=0, so c and h stay identically zero forever; padded input channels of
    x / h multiply zero weight rows.  Any nonzero initial state or bias in the
    padded lanes would leak.
    """
    in_dim = w_ih.shape[1]
    w_ih4 = w_ih.reshape(4, H, in_dim)
    wih_p = jnp.zeros((4, HP, din_pad), jnp.float32)
    for (s0, s1, d0) in col_map:
        wih_p = wih_p.at[:, :H, d0:d0 + (s1 - s0)].set(w_ih4[:, :, s0:s1])
    whh_p = jnp.zeros((4, HP, HP), jnp.float32).at[:, :H, :H].set(w_hh.reshape(4, H, H))
    b_p = jnp.zeros((4, HP), jnp.float32).at[:, :H].set((b_ih + b_hh).reshape(4, H))
    wih_t = wih_p.reshape(4 * HP, din_pad).T.astype(jnp.bfloat16)   # (din_pad, 4*HP)
    whh_t = whh_p.reshape(4 * HP, HP).T.astype(jnp.bfloat16)        # (HP, 4*HP)
    return wih_t, whh_t, b_p.reshape(1, 4 * HP)


def lstm_forward(x, lstm_params):
    """2-layer bidirectional LSTM, eval mode (inter-layer dropout = identity).
    x: (T, B, HP) lane-padded.  Returns lane-padded (T, B, 2*HP)."""
    inp = x
    for layer in range(2):
        wih_all, whh_all, b_all = lstm_params[layer]
        hs = pallas_lstm_layer(inp, wih_all, whh_all, b_all)     # (2, T, B, HP)
        inp = jnp.concatenate([hs[0], hs[1]], axis=-1)           # (T, B, 2*HP)
    return inp


# -------------------------- graph construction glue ------------------------

def edge_perms(l, window_past, window_future):
    all_perms = set()
    array = np.arange(l)
    for j in range(l):
        if window_past == -1 and window_future == -1:
            eff_array = array
        elif window_past == -1:
            eff_array = array[:min(l, j + window_future + 1)]
        elif window_future == -1:
            eff_array = array[max(0, j - window_past):]
        else:
            eff_array = array[max(0, j - window_past):min(l, j + window_future + 1)]
        for item in eff_array:
            all_perms.add((j, int(item)))
    return list(all_perms)


# ------------------------------ DGCN forward --------------------------------

def dgcn_forward(params, t5features, t5attention_mask, qmask, umask, seq_lengths):
    bs, sesslen, seqlen = t5features.shape
    ids = t5features.reshape(-1, seqlen)                           # (bs*sesslen, 128)

    # TODO(synk): BertModel.from_pretrained loads a pretrained checkpoint (disallowed
    # here); replaced with a deterministic embedding lookup producing last_hidden_state.
    last_hidden = params['bert_emb'][ids]                          # (N, 128, 768)

    # proj1: Linear(768 -> 100), output lane-padded to 128 (exact)  (Pallas matmul)
    n_rows = bs * sesslen * seqlen
    ptm = pallas_linear(last_hidden.reshape(n_rows, D_BERT),
                        params['proj1_w_pad'], params['proj1_b_pad'])
    x0 = ptm.reshape(bs * sesslen, seqlen, HP)                     # (seq, batch, feat) for nn.LSTM

    # 2-layer bidirectional LSTM (fused per-layer recurrence kernels)
    emotions_pad = lstm_forward(x0, params['lstm'])                # (bs*sesslen, 128, 2*HP)

    # emotions.view(2,-1,S,200).permute(1,0,2,3) -> (sesslen, bs, 128, 2H) (here lane-padded)
    feats4 = emotions_pad.reshape(bs, sesslen, seqlen, 2 * HP).transpose(1, 0, 2, 3)
    # TODO(synk): the reference feeds this 4-D tensor into MaskedEdgeAttention whose
    # softmax/permute(1,2,0) only supports 3-D (seq_len, batch, vector); we mean-pool
    # the token axis to recover that documented contract.
    M_pad = feats4.mean(axis=2)                                    # (sesslen, bs, 2*HP), zero-padded lanes
    M_real = jnp.concatenate([M_pad[..., :H], M_pad[..., HP:HP + H]], axis=-1)  # (L, B, 2H)

    # ---- MaskedEdgeAttention, attn_type='attn1' (fused scalar proj + softmax + renorm) ----
    L, B = sesslen, bs
    edge_ind = [edge_perms(int(l), WINDOW_PAST, WINDOW_FUTURE) for l in seq_lengths]
    # transposed mask layout (B, L, MAX_SEQ_LEN): mask_t[i, b, a] = 1 for edge (a, b)
    mask_np = np.zeros((B, L, MAX_SEQ_LEN), np.float32)
    for i, edges in enumerate(edge_ind):
        for (a, b) in edges:
            mask_np[i, b, a] = 1.0
    M_bt = jnp.transpose(M_pad, (1, 0, 2))                         # (B, L, 2*HP)
    scores_t = pallas_edge_attention(M_bt, params['edge_scalar_w_pad'],
                                     jnp.asarray(mask_np))         # scores_t[b,l,q] == scores[b,q,l]

    # ---- batch_graphify bookkeeping (host glue) ----
    node_features = jnp.concatenate(
        [M_real[:int(seq_lengths[j]), j, :] for j in range(B)], axis=0)
    qmask_np = np.asarray(qmask)
    edge_index, edge_type, norm_idx, edge_index_lengths = [], [], [], []
    length_sum = 0
    for j in range(B):
        perms1 = edge_perms(int(seq_lengths[j]), WINDOW_PAST, WINDOW_FUTURE)
        perms2 = [(a + length_sum, b + length_sum) for a, b in perms1]
        length_sum += int(seq_lengths[j])
        edge_index_lengths.append(len(perms1))
        for (a, b), (a2, b2) in zip(perms1, perms2):
            edge_index.append((a2, b2))
            norm_idx.append((j, a, b))
            sp0 = int(np.nonzero(qmask_np[a, j, :] == 1)[0][0])
            sp1 = int(np.nonzero(qmask_np[b, j, :] == 1)[0][0])
            edge_type.append(EDGE_TYPE_MAPPING[str(sp0) + str(sp1) + ('0' if a < b else '1')])
    nidx = jnp.asarray(norm_idx, jnp.int32)
    edge_norm = scores_t[nidx[:, 0], nidx[:, 2], nidx[:, 1]]       # == scores[j, a, b]
    edge_index = jnp.asarray(edge_index, jnp.int32).T
    edge_type = jnp.asarray(edge_type, jnp.int32)
    # Reference forward only prints `features` (node_features) and returns None;
    # we return the graphified tensors so the result can be blocked on / inspected.
    return node_features, edge_index, edge_norm, edge_type, edge_index_lengths


# ------------------------------ parameter init ------------------------------

def init_params(key):
    ks = jax.random.split(key, 16)
    u = lambda k, shape, s: jax.random.uniform(k, shape, jnp.float32, -s, s)

    proj1_w = u(ks[1], (D_BERT, D_PROJ), 1.0 / np.sqrt(D_BERT))
    proj1_b = u(ks[2], (D_PROJ,), 1.0 / np.sqrt(D_BERT))
    proj1_w_pad = jnp.zeros((D_BERT, HP), jnp.float32).at[:, :D_PROJ].set(proj1_w)
    proj1_b_pad = jnp.zeros((HP,), jnp.float32).at[:D_PROJ].set(proj1_b)

    edge_w = u(ks[3], (2 * H, MAX_SEQ_LEN), 1.0 / np.sqrt(2 * H))
    edge_w_pad = (jnp.zeros((2 * HP, MAX_SEQ_LEN), jnp.float32)
                  .at[:H, :].set(edge_w[:H])
                  .at[HP:HP + H, :].set(edge_w[H:2 * H]))

    params = {
        'bert_emb': u(ks[0], (VOCAB, D_BERT), 0.05),
        'proj1_w_pad': proj1_w_pad,
        'proj1_b_pad': proj1_b_pad,
        'edge_scalar_w_pad': edge_w_pad.astype(jnp.bfloat16),
    }

    lstm = []
    kidx = 4
    for layer in range(2):
        in_dim = D_PROJ if layer == 0 else 2 * H
        din_pad = HP if layer == 0 else 2 * HP
        col_map = [(0, D_PROJ, 0)] if layer == 0 else [(0, H, 0), (H, 2 * H, HP)]
        wihs, whhs, biases = [], [], []
        for d in range(2):
            s = 1.0 / np.sqrt(H)
            sub = jax.random.split(ks[kidx], 4)
            kidx += 1
            w_ih = u(sub[0], (4 * H, in_dim), s)
            w_hh = u(sub[1], (4 * H, H), s)
            b_ih = u(sub[2], (4 * H,), s)
            b_hh = u(sub[3], (4 * H,), s)
            wih_t, whh_t, b = pad_lstm_dir_weights(w_ih, w_hh, b_ih, b_hh, din_pad, col_map)
            wihs.append(wih_t)
            whhs.append(whh_t)
            biases.append(b)
        lstm.append((jnp.stack(wihs), jnp.stack(whhs), jnp.stack(biases)))
    params['lstm'] = lstm
    return params


# ----------------------------------- main -----------------------------------

if __name__ == "__main__":
    key = jax.random.PRNGKey(0)
    pkey, dkey = jax.random.split(key)
    params = init_params(pkey)

    bs, sesslen, seqlen = 2, 4, 128          # seqlen must be 128 (view(-1, 128) in reference)
    t5features = jax.random.randint(dkey, (bs, sesslen, seqlen), 0, VOCAB, dtype=jnp.int32)
    t5attention_mask = jnp.ones((bs, sesslen, seqlen), jnp.int32)
    speakers = np.array([[0, 1], [1, 0], [0, 0], [1, 1]], dtype=np.int32)   # (sesslen, bs)
    qmask = jnp.asarray(np.eye(2, dtype=np.float32)[speakers])              # (sesslen, bs, 2)
    umask = jnp.ones((sesslen, bs), jnp.float32)
    seq_lengths = [4, 3]

    out = dgcn_forward(params, t5features, t5attention_mask, qmask, umask, seq_lengths)
    node_features, edge_index, edge_norm, edge_type, edge_index_lengths = out
    jax.block_until_ready((node_features, edge_norm))
    assert node_features.shape == (sum(seq_lengths), 2 * H)
    assert edge_norm.shape[0] == sum(l * l for l in seq_lengths)
    print("KERNEL_OK")
</pallas_src>

<mosaic_0001>
module attributes {stable_mosaic.version = 11 : i64} {
  func.func @_linear_kernel(%arg0: i32, %arg1: memref<512x768xf32, #tpu.memory_space<vmem>>, %arg2: memref<768x128xbf16, #tpu.memory_space<vmem>>, %arg3: memref<1x128xf32, #tpu.memory_space<vmem>>, %arg4: memref<512x128xf32, #tpu.memory_space<vmem>>) attributes {dimension_semantics = [#tpu.dimension_semantics<parallel>], iteration_bounds = array<i64: 2>, scalar_prefetch = 0 : i64, scratch_operands = 0 : i64, tpu.core_type = #tpu.core_type<tc>, window_params = [{transform_indices = @transform_0, window_bounds = array<i64: 512, 768>}, {pipeline_mode = #tpu.pipeline_mode<synchronous>, transform_indices = @transform_1, window_bounds = array<i64: 768, 128>}, {pipeline_mode = #tpu.pipeline_mode<synchronous>, transform_indices = @transform_2, window_bounds = array<i64: 1, 128>}, {transform_indices = @transform_3, window_bounds = array<i64: 512, 128>}]} {
    %c0 = arith.constant 0 : index
    %c0_0 = arith.constant 0 : index
    %0 = vector.load %arg1[%c0, %c0_0] : memref<512x768xf32, #tpu.memory_space<vmem>>, vector<512x768xf32>
    %1 = arith.truncf %0 : vector<512x768xf32> to vector<512x768xbf16>
    %c0_1 = arith.constant 0 : index
    %c0_2 = arith.constant 0 : index
    %2 = vector.load %arg2[%c0_1, %c0_2] : memref<768x128xbf16, #tpu.memory_space<vmem>>, vector<768x128xbf16>
    %cst = arith.constant dense<0.000000e+00> : vector<512x128xf32>
    %3 = tpu.matmul %1, %2, %cst {dimension_numbers = #tpu.dot_dimension_numbers<[1], [0], [0], [1], [0, 0, 1, 1], [], []>} : vector<512x768xbf16>, vector<768x128xbf16>, vector<512x128xf32> -> vector<512x128xf32>
    %c0_3 = arith.constant 0 : index
    %c0_4 = arith.constant 0 : index
    %4 = vector.load %arg3[%c0_3, %c0_4] : memref<1x128xf32, #tpu.memory_space<vmem>>, vector<1x128xf32>
    %5 = vector.broadcast %4 : vector<1x128xf32> to vector<512x128xf32>
    %6 = arith.addf %3, %5 : vector<512x128xf32>
    %c0_5 = arith.constant 0 : index
    %c0_6 = arith.constant 0 : index
    %7 = vector.load %arg4[%c0_5, %c0_6] : memref<512x128xf32, #tpu.memory_space<vmem>>, vector<512x128xf32>
    tpu.vector_store %arg4[%c0_5, %c0_6], %6 {strides = array<i32>} : memref<512x128xf32, #tpu.memory_space<vmem>>, vector<512x128xf32>,
    return
  }
  func.func @transform_0(%arg0: i32) -> (i32, i32) {
    %c0_i32 = arith.constant 0 : i32
    %c0_i32_0 = arith.constant 0 : i32
    return %arg0, %c0_i32 : i32, i32
  }
  func.func @transform_1(%arg0: i32) -> (i32, i32) {
    %c0_i32 = arith.constant 0 : i32
    %c0_i32_0 = arith.constant 0 : i32
    %c0_i32_1 = arith.constant 0 : i32
    return %c0_i32, %c0_i32_0 : i32, i32
  }
  func.func @transform_2(%arg0: i32) -> (i32, i32) {
    %c0_i32 = arith.constant 0 : i32
    %c0_i32_0 = arith.constant 0 : i32
    %c0_i32_1 = arith.constant 0 : i32
    return %c0_i32, %c0_i32_0 : i32, i32
  }
  func.func @transform_3(%arg0: i32) -> (i32, i32) {
    %c0_i32 = arith.constant 0 : i32
    %c0_i32_0 = arith.constant 0 : i32
    return %arg0, %c0_i32 : i32, i32
  }
}

</mosaic_0001>

<bundles_post_ra>
// kernel: tpu_custom_call.1
= control target key start
LH: loop header
LB: loop body
LE: loop exit
PB: predicated region body
PF: predicated region fallthrough
CT: control target
= control target key end

     0   :  { %8 = vsyncpa [#allocation3], 0  ;;  %s3872_s0 = inlined_call_operand.hbm [shape: f32[1024,768], index: 0, kind: input, shape index: {}]   ;;  %s3873_s1 = inlined_call_operand.hbm [shape: bf16[768,128], index: 1, kind: input, shape index: {}]   ;;  %s3874_s2 = inlined_call_operand.hbm [shape: f32[1,128], index: 2, kind: input, shape index: {}]   ;;  %s3875_s3 = inlined_call_operand.hbm [shape: f32[1024,128], index: 3, kind: output, shape index: {}]  }
   0x1   :  { %10 = vsyncpa [#allocation3 + $0x1], 0 }
   0x2   :  { %11 = vsyncpa [#allocation6], 0 }
   0x3   :  { %12 = vsyncpa [#allocation4], 0 }
   0x4   :  { %14 = vsyncpa [#allocation4 + $0x1], 0  ;;  %s2893_s12 = smov 0   ;;  %s2895_s13 = smov 0  }
   0x5   :  { %s2897_s14 = smov 0   ;;  %s2899_s15 = smov 0  }
   0x6 LB: > { %s2914_s16 = sadd.s32 4294967295, %s2860_s15   ;;  %s2224_s17 = sadd.s32 4294967294, %s2860_s15   ;;  %s2860_s15 = sphi %s2899_s15, %s3895_s15   ;;  %s2856_s14 = sphi %s2897_s14, %s3894_s14   ;;  %s2852_s13 = sphi %s2895_s13, %s3893_s13   ;;  %s2848_s12 = sphi %s2893_s12, %s3892_s12  }
   0x7   : > { %p40_p0 = scmp.ne.s32.totalorder %s2852_s13, %s2848_s12  ;;  %p3876_p1 = scmp.eq.s32.totalorder %s2914_s16, 0 }
   0x8   : > { %p112_p3 = scmp.eq.s32.totalorder %s2224_s17, 1  ;;  %p2225_p5 = scmp.ge.s32.totalorder %s2860_s15, 1 }
   0x9   : > { %p2923_p4 = por %p3876_p1, %p40_p0  ;;  %p119_p7 = scmp.lt.s32.totalorder %s2860_s15, 3 }
   0xa   : > { %p2928_p6 = por %p112_p3, %p40_p0  ;;  %s2862_s21 = smov [#allocation5]  }
   0xb   : > { %s3879_s18 = scalar_select %p2923_p4, 1, 0 }
   0xc   : > { %s3880_s19 = scalar_select %p2928_p6, 1, 0 }
   0xd   : > { %p2933_p8 = pnand %p2225_p5, %p119_p7  ;;  %s131_s22 = sshll.u32 %s2862_s21, 4  ;;  %s2937_s22 = int_to_ptr.vmem [resolvable:$true] %s131_s22 }
   0xe   : > { %s2863_s24 = smov [#allocation7]   ;;  %s2704_s28 = scalar_lea.hbm %s3873_s1, 6144 }
   0xf   : > { %p2594_p9 = pneg %p2933_p8  ;;  %s145_s25 = sshll.u32 %s2863_s24, 4  ;;  %s2948_s25 = int_to_ptr.vmem [resolvable:$true] %s145_s25 }
  0x10   : > { %p2705_p12 = scmp.ne.s32.totalorder %s3873_s1, %s2704_s28  ;;  %p2711_p5 = scmp.lt.u32.totalorder %s2704_s28, %s3873_s1 }
  0x11   : > { %p2944_p11 = pnand %p2594_p9, %p3876_p1 }
  0x13   : > { %p2706_p13 = pneg %p2944_p11 }
  0x15   : > { %p2707_p0 = pnand %p2706_p13, %p2705_p12 }
  0x17   : > { %p2708_p3 = pneg %p2707_p0 }
  0x19   : > { %p2713_p7 = pnand %p2711_p5, %p2708_p3 }
  0x1b   : > { %2716 = shalt.err (!%p2713_p7)
}
  0x1c   : > { %s2717_s6 = scalar_lea.vmem %s2937_s22, 6144  ;;  %p2725_p2 = scmp.lt.s32.totalorder %s2937_s22, %s2937_s22 }
  0x1d   : > { %p2718_p9 = scmp.ne.s32.totalorder %s2937_s22, %s2717_s6  ;;  %p2726_p12 = scmp.lt.s32.totalorder %s2717_s6, %s2717_s6 }
  0x1f   : > { %p2720_p10 = pnand %p2718_p9, %p2706_p13  ;;  %p2727_p0 = por %p2726_p12, %p2725_p2 }
  0x21   : > { %p2721_p1 = pneg %p2720_p10 }
  0x23   : > { %p2728_p6 = pnand %p2727_p0, %p2721_p1 }
  0x25   : > { %2731 = shalt.err (!%p2728_p6)
}
  0x26   : > { %s2864_s7 = smov 64   ;;  %s2865_s8 = smov 4  }
  0x27   : > { %2597 = dma.hbm_to_vmem [thread:$0]  (!%p2944_p11), %s3873_s1, 6144, %s2937_s22, [#allocation6], %s2864_s7, %s2864_s7, %s2865_s8  }
  0x28   : > { %s2732_s21 = scalar_lea.hbm %s3874_s2, 16 }
  0x29   : > { %p2733_p2 = scmp.ne.s32.totalorder %s3874_s2, %s2732_s21  ;;  %p2739_p10 = scmp.lt.u32.totalorder %s2732_s21, %s3874_s2 }
  0x2b   : > { %p2735_p1 = pnand %p2733_p2, %p2706_p13 }
  0x2d   : > { %p2736_p6 = pneg %p2735_p1 }
  0x2f   : > { %p2741_p3 = pnand %p2739_p10, %p2736_p6 }
  0x31   : > { %2744 = shalt.err (!%p2741_p3)
}
  0x32   : > { %s2745_s22 = scalar_lea.vmem %s2948_s25, 16  ;;  %s2752_s29 = scalar_lea.vmem %s2948_s25, 32 }
  0x33   : > { %p2746_p5 = scmp.ne.s32.totalorder %s2948_s25, %s2745_s22  ;;  %p2753_p12 = scmp.lt.s32.totalorder %s2948_s25, %s2948_s25 }
  0x34   : > { %p2754_p0 = scmp.lt.s32.totalorder %s2752_s29, %s2745_s22 }
  0x35   : > { %p2748_p7 = pnand %p2746_p5, %p2706_p13 }
  0x36   : > { %p2755_p2 = por %p2754_p0, %p2753_p12 }
  0x37   : > { %p2749_p9 = pneg %p2748_p7 }
  0x39   : > { %p2756_p1 = pnand %p2755_p2, %p2749_p9 }
  0x3b   : > { %2759 = shalt.err (!%p2756_p1)
}
  0x3c   : > { %2600 = dma.hbm_to_vmem [thread:$0]  (!%p2944_p11), %s3874_s2, 16, %s2948_s25, [#allocation6]  }
  0x3d   : > { %s3004_s5 = sadd.s32 1, %s2860_s15   ;;  %s27_s23 = sadd.s32 1, %s2856_s14 }
  0x3e   : > { %s24_s6 = ssub.s32 %s2860_s15, %s3004_s5  ;;  %p34_p13 = scmp.ne.s32.totalorder %s2856_s14, %s2852_s13 }
  0x3f   : > { %p25_p6 = scmp.eq.s32.totalorder %s24_s6, 0  ;;  %p35_p10 = scmp.eq.s32.totalorder %s2860_s15, 0 }
  0x40   : > { %p3883_p3 = scmp.eq.s32.totalorder %s2914_s16, 1  ;;  %p2611_p7 = scmp.lt.s32.totalorder %s2860_s15, 2 }
  0x41   : > { %s3020_s8 = scalar_select %p25_p6, %s2856_s14, %s27_s23  }
  0x42   : > { %p3014_p5 = por %p3883_p3, %p34_p13  ;;  %p36_p9 = por %p35_p10, %p34_p13 }
  0x43   : > { %s156_s9 = sand.u32 1, %s2856_s14   ;;  %s2580_s25 = smul.u32 49152, %s2860_s15 }
  0x44   : > { %s3884_s7 = scalar_select %p3014_p5, 1, 0 }
  0x45   : > { %s2579_s10 = smul.u32 3072, %s156_s9  ;;  %p3024_p11 = pnand %p2611_p7, %p36_p9 }
  0x46   : > { %s3031_s24 = scalar_lea.hbm %s3872_s0, %s2580_s25  ;;  %s3035_s28 = scalar_lea.sflag [#allocation3], %s156_s9 }
  0x47   : > { %s160_s26 = scalar_lea.vmem [#allocation2], %s2579_s10  ;;  %s2760_s22 = scalar_lea.hbm %s3031_s24, 49152 }
  0x48   : > { %s168_s27 = sshll.u32 %s160_s26, 4  ;;  %p2761_p12 = scmp.ne.s32.totalorder %s3031_s24, %s2760_s22  ;;  %s3033_s27 = int_to_ptr.vmem [resolvable:$true] %s168_s27 }
  0x49   : > { %p2762_p0 = pneg %p3024_p11  ;;  %s2765_s4 = scalar_lea.hbm %s3872_s0, 98304 }
  0x4a   : > { %p2766_p13 = scmp.lt.u32.totalorder %s3031_s24, %s3872_s0  ;;  %p2767_p6 = scmp.lt.u32.totalorder %s2765_s4, %s2760_s22 }
  0x4b   : > { %p2763_p2 = pnand %p2762_p0, %p2761_p12  ;;  %p2769_p3 = scmp.lt.u32.totalorder %s2760_s22, %s3031_s24 }
  0x4c   : > { %p2768_p10 = por %p2767_p6, %p2766_p13 }
  0x4d   : > { %p2764_p1 = pneg %p2763_p2 }
  0x4e   : > { %p2770_p7 = por %p2769_p3, %p2768_p10 }
  0x50   : > { %p2771_p9 = pnand %p2770_p7, %p2764_p1 }
  0x52   : > { %2774 = shalt.err (!%p2771_p9)
}
  0x53   : > { %s2775_s9 = scalar_lea.vmem %s3033_s27, 49152  ;;  %s2866_s10 = smov [#allocation2]  }
  0x54   : > { %p2776_p12 = scmp.ne.s32.totalorder %s3033_s27, %s2775_s9  ;;  %s2780_s25 = sshll.u32 %s2866_s10, 4  ;;  %s2781_s25 = int_to_ptr.vmem [resolvable:$false] %s2780_s25 }
  0x55   : > { %s2782_s17 = scalar_lea.vmem %s2781_s25, 98304  ;;  %p2783_p4 = scmp.lt.s32.totalorder %s3033_s27, %s2781_s25 }
  0x56   : > { %p2778_p2 = pnand %p2776_p12, %p2762_p0  ;;  %p2784_p13 = scmp.lt.s32.totalorder %s2782_s17, %s2775_s9 }
  0x58   : > { %p2779_p5 = pneg %p2778_p2  ;;  %p2785_p6 = por %p2784_p13, %p2783_p4 }
  0x5a   : > { %p2786_p10 = pnand %p2785_p6, %p2779_p5 }
  0x5c   : > { %2789 = shalt.err (!%p2786_p10)
}
  0x5d   : > { %s2867_s21 = smov 768   ;;  %s2868_s26 = smov 48  }
  0x5e   : > { %2604 = dma.hbm_to_vmem [thread:$0]  (!%p3024_p11), %s3031_s24, 49152, %s3033_s27, %s3035_s28, %s2867_s21, %s2867_s21, %s2868_s26  }
  0x5f   : > { %180 = sbr.rel (%p2933_p8) target bundleno = 780 (0x30c), region = 32  ;;  %s3066_s22 = sand.u32 (!%p2933_p8), 1, %s2852_s13  }
  0x60   : > { %s2581_s29 = smul.u32 (!%p2933_p8), 3072, %s3066_s22  ;;  %s183_s30 = scalar_lea.sflag (!%p2933_p8), [#allocation3], %s3066_s22 }
  0x61   : > { %p3886_p4 = scmp.ne.s32.totalorder (!%p2933_p8), %s3879_s18, 0 }
  0x62   : > { %s3070_s4 = scalar_lea.vmem (!%p2933_p8), [#allocation2], %s2581_s29 }
  0x66   : > { %2835 = dma.done.wait (%p3886_p4), %s183_s30, 49152  }
  0x67   : > { %2837 = vsyncadd (%p3886_p4), %s183_s30, 4294918144  ;;  %p3887_p5 = scmp.eq.s32.totalorder %s2914_s16, 0 }
  0x69   : > { %2839 = dma.done.wait (%p3887_p5), [#allocation6], 6160   ;;  %p3888_p8 = pmov %p3887_p5 }
  0x6a   : > { %v2869_v0 = vmov 0   ;;  %v2656_v1 = vld [vmem:[#allocation5] sm:$0xff]   ;;  %v2658_v3 = vld [vmem:[#allocation5 + $0x8] sm:$0xff]   ;;  %v2660_v5 = vld [vmem:[#allocation5 + $0x10] sm:$0xff]   ;;  %s2235_s18 = sshll.u32 %s3066_s22, 9  ;;  %s2290_s11 = sshll.u32 %s2914_s16, 13 }
  0x6b   : > { %2841 = vsyncadd (%p3888_p8), [#allocation6], 4294961136  ;;  %1187 = vmatprep.subr.bf16.mxu1 %v2869_v0  ;;  %1476 = vmatprep.subr.bf16.mxu0 %v2869_v0  ;;  %v3082_v2 = vld [vmem:[#allocation5 + $0x80] sm:$0xff]   ;;  %v3086_v4 = vld [vmem:[#allocation5 + $0x88] sm:$0xff]   ;;  %s3635_s20 = scalar_lea.vmem [#allocation8], %s2235_s18  ;;  %s3824_s23 = scalar_lea.hbm %s3875_s3, %s2290_s11 }
  0x6c   : > { %1188 = vmatpush1.bf16.msra.mxu1 %v2656_v1  ;;  %1477 = vmatpush1.bf16.msra.mxu0 %v3082_v2  ;;  %v3091_v6 = vld [vmem:[#allocation5 + $0x90] sm:$0xff]   ;;  %v2662_v7 = vld [vmem:[#allocation5 + $0x18] sm:$0xff]   ;;  %v2664_v9 = vld [vmem:[#allocation5 + $0x20] sm:$0xff]   ;;  %s2132_s24 = sshll.u32 %s3635_s20, 4  ;;  %s2119_s16 = scalar_lea.sflag [#allocation4], %s3066_s22  ;;  %s3826_s24 = int_to_ptr.vmem [resolvable:$true] %s2132_s24 }
  0x6d   : > { %1189 = vmatprep.subr.bf16.mxu1 %v2869_v0  ;;  %1478 = vmatprep.subr.bf16.mxu0 %v2869_v0  ;;  %v3096_v8 = vld [vmem:[#allocation5 + $0x98] sm:$0xff]   ;;  %v3101_v10 = vld [vmem:[#allocation5 + $0xa0] sm:$0xff]   ;;  %v2666_v11 = vld [vmem:[#allocation5 + $0x28] sm:$0xff]   ;;  %s2790_s6 = scalar_lea.vmem %s3826_s24, 8192  ;;  %p3889_p0 = scmp.ne.s32.totalorder %s3884_s7, 0 }
  0x6e   : > { %v3106_v12 = vld [vmem:[#allocation5 + $0xa8] sm:$0xff]   ;;  %v2668_v13 = vld [vmem:[#allocation5 + $0x30] sm:$0xff]   ;;  %v2670_v15 = vld [vmem:[#allocation5 + $0x38] sm:$0xff]   ;;  %p2791_p11 = scmp.ne.s32.totalorder %s3826_s24, %s2790_s6  ;;  %s2870_s9 = smov [#allocation8]  }
  0x6f   : > { %v3111_v14 = vld [vmem:[#allocation5 + $0xb0] sm:$0xff]   ;;  %v3116_v16 = vld [vmem:[#allocation5 + $0xb8] sm:$0xff]   ;;  %v2672_v17 = vld [vmem:[#allocation5 + $0x40] sm:$0xff]   ;;  %s2794_s10 = sshll.u32 %s2870_s9, 4  ;;  %s2795_s10 = int_to_ptr.vmem [resolvable:$false] %s2794_s10 }
  0x70   : > { %1190 = vmatpush1.bf16.msra.mxu1 %v2658_v3  ;;  %1479 = vmatpush1.bf16.msra.mxu0 %v3086_v4  ;;  %v3121_v18 = vld [vmem:[#allocation5 + $0xc0] sm:$0xff]   ;;  %v221_v19 = vld [vmem:[%s3070_s4 + $0x8] sm:$0xff]  ;;  %v227_v20 = vld [vmem:[%s3070_s4 + $0x38] sm:$0xff]  ;;  %p2792_p1 = pnand %p2791_p11, %p3889_p0  ;;  %s2796_s25 = scalar_lea.vmem %s2795_s10, 16384 }
  0x71   : > { %1191 = vmatprep.subr.bf16.mxu1 %v2869_v0  ;;  %1480 = vmatprep.subr.bf16.mxu0 %v2869_v0  ;;  %v223_v21 = vld [vmem:[%s3070_s4 + $0x18] sm:$0xff]  ;;  %v605_v22 = vpack.c.bf16 %v227_v20, %v221_v19  ;;  %v229_v23 = vld [vmem:[%s3070_s4 + $0x48] sm:$0xff]  ;;  %v2676_v27 = vld [vmem:[#allocation5 + $0x50] sm:$0xff]   ;;  %p2797_p7 = scmp.lt.s32.totalorder %s3826_s24, %s2795_s10  ;;  %p2798_p9 = scmp.lt.s32.totalorder %s2796_s25, %s2790_s6 }
  0x72   : > { %v2674_v24 = vld [vmem:[#allocation5 + $0x48] sm:$0xff]   ;;  %v607_v25 = vpack.c.bf16 %v229_v23, %v223_v21  ;;  %v3135_v28 = vld [vmem:[#allocation5 + $0xd0] sm:$0xff]   ;;  %v2678_v29 = vld [vmem:[#allocation5 + $0x58] sm:$0xff]   ;;  %p2793_p3 = pneg %p2792_p1 }
  0x73   : > { %v3130_v26 = vld [vmem:[#allocation5 + $0xc8] sm:$0xff]   ;;  %1219 = vmatprep.mubr.bf16.mxu1 %v605_v22  ;;  %v3140_v30 = vld [vmem:[#allocation5 + $0xd8] sm:$0xff]   ;;  %v2680_v31 = vld [vmem:[#allocation5 + $0x60] sm:$0xff]   ;;  %p2799_p12 = por %p2798_p9, %p2797_p7 }
  0x74   : > { %1192 = vmatpush1.bf16.msra.mxu1 %v2660_v5  ;;  %1481 = vmatpush1.bf16.msra.mxu0 %v3091_v6  ;;  %v3145_v32 = vld [vmem:[#allocation5 + $0xe0] sm:$0xff]   ;;  %v2682_v33 = vld [vmem:[#allocation5 + $0x68] sm:$0xff]   ;;  %v2684_v35 = vld [vmem:[#allocation5 + $0x70] sm:$0xff]  }
  0x75   : > { %1193 = vmatprep.subr.bf16.mxu1 %v2869_v0  ;;  %1482 = vmatprep.subr.bf16.mxu0 %v2869_v0  ;;  %v3150_v34 = vld [vmem:[#allocation5 + $0xe8] sm:$0xff]   ;;  %v3155_v36 = vld [vmem:[#allocation5 + $0xf0] sm:$0xff]   ;;  %v2686_v37 = vld [vmem:[#allocation5 + $0x78] sm:$0xff]   ;;  %p2800_p2 = pnand %p2799_p12, %p2793_p3 }
  0x76   : > { %1508 = vmatprep.mubr.bf16.mxu0 %v607_v25  ;;  %v3158_v38 = vld [vmem:[#allocation5 + $0xf8] sm:$0xff]   ;;  %v220_v39 = vld [vmem:[%s3070_s4] sm:$0xff]  ;;  %v226_v40 = vld [vmem:[%s3070_s4 + $0x30] sm:$0xff] }
  0x77   : > { %v222_v41 = vld [vmem:[%s3070_s4 + $0x10] sm:$0xff]  ;;  %v228_v42 = vld [vmem:[%s3070_s4 + $0x40] sm:$0xff]  ;;  %v233_v43 = vld [vmem:[%s3070_s4 + $0x68] sm:$0xff]  ;;  %v604_v45 = vpack.c.bf16 %v226_v40, %v220_v39 }
  0x78   : > { %1194 = vmatpush1.bf16.msra.mxu1 %v2662_v7  ;;  %1483 = vmatpush1.bf16.msra.mxu0 %v3096_v8  ;;  %v239_v44 = vld [vmem:[%s3070_s4 + $0x98] sm:$0xff]  ;;  %v241_v47 = vld [vmem:[%s3070_s4 + $0xa8] sm:$0xff]  ;;  %v606_v48 = vpack.c.bf16 %v228_v42, %v222_v41  ;;  %v2688_v49 = vld [vmem:[#allocation5 + $0x100] sm:$0xff]  }
  0x79   : > { %1195 = vmatprep.subr.bf16.mxu1 %v2869_v0  ;;  %1484 = vmatprep.subr.bf16.mxu0 %v2869_v0  ;;  %v235_v46 = vld [vmem:[%s3070_s4 + $0x78] sm:$0xff]  ;;  %v611_v50 = vpack.c.bf16 %v239_v44, %v233_v43  ;;  %v232_v52 = vld [vmem:[%s3070_s4 + $0x60] sm:$0xff]  ;;  %v238_v53 = vld [vmem:[%s3070_s4 + $0x90] sm:$0xff] }
  0x7a   : > { %v613_v51 = vpack.c.bf16 %v241_v47, %v235_v46  ;;  %v234_v54 = vld [vmem:[%s3070_s4 + $0x70] sm:$0xff]  ;;  %v240_v55 = vld [vmem:[%s3070_s4 + $0xa0] sm:$0xff]  ;;  %v2689_v56 = vld [vmem:[#allocation5 + $0x108] sm:$0xff]   ;;  %v610_v61 = vpack.c.bf16 %v238_v53, %v232_v52 }
  0x7b   : > { %v245_v57 = vld [vmem:[%s3070_s4 + $0xc8] sm:$0xff]  ;;  %v251_v58 = vld [vmem:[%s3070_s4 + $0xf8] sm:$0xff]  ;;  %v612_v62 = vpack.c.bf16 %v240_v55, %v234_v54  ;;  %v244_v3 = vld [vmem:[%s3070_s4 + $0xc0] sm:$0xff] }
  0x7c   : > { %1196 = vmatpush1.bf16.msra.mxu1 %v2664_v9  ;;  %1485 = vmatpush1.bf16.msra.mxu0 %v3101_v10  ;;  %v247_v59 = vld [vmem:[%s3070_s4 + $0xd8] sm:$0xff]  ;;  %v253_v60 = vld [vmem:[%s3070_s4 + $0x108] sm:$0xff]  ;;  %v617_v63 = vpack.c.bf16 %v251_v58, %v245_v57  ;;  %v250_v5 = vld [vmem:[%s3070_s4 + $0xf0] sm:$0xff] }
  0x7d   : > { %1197 = vmatprep.subr.bf16.mxu1 %v2869_v0  ;;  %1486 = vmatprep.subr.bf16.mxu0 %v2869_v0  ;;  %v619_v1 = vpack.c.bf16 %v253_v60, %v247_v59  ;;  %v246_v7 = vld [vmem:[%s3070_s4 + $0xd0] sm:$0xff]  ;;  %v252_v9 = vld [vmem:[%s3070_s4 + $0x100] sm:$0xff]  ;;  %v616_v19 = vpack.c.bf16 %v250_v5, %v244_v3  ;;  %v281_v46 = vld [vmem:[%s3070_s4 + $0x1e8] sm:$0xff] }
  0x7e   : > { %v618_v20 = vpack.c.bf16 %v252_v9, %v246_v7  ;;  %v2692_v23 = vld [vmem:[#allocation5 + $0x120] sm:$0xff]   ;;  %v258_v25 = vld [vmem:[%s3070_s4 + $0x130] sm:$0xff]  ;;  %v287_v47 = vld [vmem:[%s3070_s4 + $0x218] sm:$0xff] }
  0x7f   : > { %v2694_v42 = vld [vmem:[#allocation5 + $0x130] sm:$0xff]   ;;  %v635_v52 = vpack.c.bf16 %v287_v47, %v281_v46  ;;  %v2696_v54 = vld [vmem:[#allocation5 + $0x140] sm:$0xff]   ;;  %v293_v58 = vld [vmem:[%s3070_s4 + $0x248] sm:$0xff] }
  0x80   : > { %1198 = vmatpush1.bf16.msra.mxu1 %v2666_v11  ;;  %1487 = vmatpush1.bf16.msra.mxu0 %v3106_v12  ;;  %v257_v11 = vld [vmem:[%s3070_s4 + $0x128] sm:$0xff]  ;;  %v274_v43 = vld [vmem:[%s3070_s4 + $0x1b0] sm:$0xff]  ;;  %v288_v57 = vld [vmem:[%s3070_s4 + $0x220] sm:$0xff] }
  0x81   : > { %1199 = vmatprep.subr.bf16.mxu1 %v2869_v0  ;;  %1488 = vmatprep.subr.bf16.mxu0 %v2869_v0  ;;  %v270_v44 = vld [vmem:[%s3070_s4 + $0x190] sm:$0xff]  ;;  %v299_v59 = vld [vmem:[%s3070_s4 + $0x278] sm:$0xff]  ;;  %v2697_v60 = vld [vmem:[#allocation5 + $0x148] sm:$0xff]  }
  0x82   : > { %v286_v55 = vld [vmem:[%s3070_s4 + $0x210] sm:$0xff]  ;;  %v300_v9 = vld [vmem:[%s3070_s4 + $0x280] sm:$0xff]  ;;  %v337_v46 = vld [vmem:[%s3070_s4 + $0x3a8] sm:$0xff] }
  0x83   : > { %v2698_v3 = vld [vmem:[#allocation5 + $0x150] sm:$0xff]  }
  0x84   : > { %1200 = vmatpush1.bf16.msra.mxu1 %v2668_v13  ;;  %1489 = vmatpush1.bf16.msra.mxu0 %v3111_v14  ;;  %v263_v13 = vld [vmem:[%s3070_s4 + $0x158] sm:$0xff]  ;;  %v298_v5 = vld [vmem:[%s3070_s4 + $0x270] sm:$0xff] }
  0x85   : > { %1201 = vmatprep.subr.bf16.mxu1 %v2869_v0  ;;  %1490 = vmatprep.subr.bf16.mxu0 %v2869_v0  ;;  %v623_v21 = vpack.c.bf16 %v263_v13, %v257_v11  ;;  %v294_v7 = vld [vmem:[%s3070_s4 + $0x250] sm:$0xff]  ;;  %v305_v11 = vld [vmem:[%s3070_s4 + $0x2a8] sm:$0xff]  ;;  %v311_v13 = vld [vmem:[%s3070_s4 + $0x2d8] sm:$0xff] }
  0x88   : > { %1202 = vmatpush1.bf16.msra.mxu1 %v2670_v15  ;;  %1491 = vmatpush1.bf16.msra.mxu0 %v3116_v16  ;;  %v259_v15 = vld [vmem:[%s3070_s4 + $0x138] sm:$0xff] }
  0x89   : > { %1203 = vmatprep.subr.bf16.mxu1 %v2869_v0  ;;  %1492 = vmatprep.subr.bf16.mxu0 %v2869_v0 }
  0x8c   : > { %1204 = vmatpush1.bf16.msra.mxu1 %v2672_v17  ;;  %1493 = vmatpush1.bf16.msra.mxu0 %v3121_v18  ;;  %v265_v17 = vld [vmem:[%s3070_s4 + $0x168] sm:$0xff] }
  0x8d   : > { %1205 = vmatprep.subr.bf16.mxu1 %v2869_v0  ;;  %1494 = vmatprep.subr.bf16.mxu0 %v2869_v0  ;;  %v625_v22 = vpack.c.bf16 %v265_v17, %v259_v15  ;;  %v307_v15 = vld [vmem:[%s3070_s4 + $0x2b8] sm:$0xff]  ;;  %v313_v17 = vld [vmem:[%s3070_s4 + $0x2e8] sm:$0xff] }
  0x90   : > { %1206 = vmatpush1.bf16.msra.mxu1 %v2674_v24  ;;  %1495 = vmatpush1.bf16.msra.mxu0 %v3130_v26  ;;  %v256_v24 = vld [vmem:[%s3070_s4 + $0x120] sm:$0xff] }
  0x91   : > { %1207 = vmatprep.subr.bf16.mxu1 %v2869_v0  ;;  %1496 = vmatprep.subr.bf16.mxu0 %v2869_v0 }
  0x94   : > { %1208 = vmatpush1.bf16.msra.mxu1 %v2676_v27  ;;  %1497 = vmatpush1.bf16.msra.mxu0 %v3135_v28  ;;  %v264_v27 = vld [vmem:[%s3070_s4 + $0x160] sm:$0xff] }
  0x95   : > { %1209 = vmatprep.subr.bf16.mxu1 %v2869_v0  ;;  %1498 = vmatprep.subr.bf16.mxu0 %v2869_v0  ;;  %v624_v39 = vpack.c.bf16 %v264_v27, %v258_v25  ;;  %v317_v25 = vld [vmem:[%s3070_s4 + $0x308] sm:$0xff]  ;;  %v323_v27 = vld [vmem:[%s3070_s4 + $0x338] sm:$0xff] }
  0x98   : > { %1210 = vmatpush1.bf16.msra.mxu1 %v2678_v29  ;;  %1499 = vmatpush1.bf16.msra.mxu0 %v3140_v30  ;;  %v269_v29 = vld [vmem:[%s3070_s4 + $0x188] sm:$0xff] }
  0x99   : > { %1211 = vmatprep.subr.bf16.mxu1 %v2869_v0  ;;  %1500 = vmatprep.subr.bf16.mxu0 %v2869_v0 }
  0x9c   : > { %1212 = vmatpush1.bf16.msra.mxu1 %v2680_v31  ;;  %1501 = vmatpush1.bf16.msra.mxu0 %v3145_v32  ;;  %v275_v31 = vld [vmem:[%s3070_s4 + $0x1b8] sm:$0xff] }
  0x9d   : > { %1213 = vmatprep.subr.bf16.mxu1 %v2869_v0  ;;  %1502 = vmatprep.subr.bf16.mxu0 %v2869_v0  ;;  %v629_v40 = vpack.c.bf16 %v275_v31, %v269_v29  ;;  %v2701_v29 = vld [vmem:[#allocation5 + $0x168] sm:$0xff]   ;;  %v319_v31 = vld [vmem:[%s3070_s4 + $0x318] sm:$0xff] }
  0xa0   : > { %1214 = vmatpush1.bf16.msra.mxu1 %v2682_v33  ;;  %1503 = vmatpush1.bf16.msra.mxu0 %v3150_v34  ;;  %v2693_v33 = vld [vmem:[#allocation5 + $0x128] sm:$0xff]  }
  0xa1   : > { %1215 = vmatprep.subr.bf16.mxu1 %v2869_v0  ;;  %1504 = vmatprep.subr.bf16.mxu0 %v2869_v0 }
  0xa4   : > { %1216 = vmatpush1.bf16.msra.mxu1 %v2684_v35  ;;  %1505 = vmatpush1.bf16.msra.mxu0 %v3155_v36  ;;  %v271_v35 = vld [vmem:[%s3070_s4 + $0x198] sm:$0xff] }
  0xa5   : > { %1217 = vmatprep.subr.bf16.mxu1 %v2869_v0  ;;  %1506 = vmatprep.subr.bf16.mxu0 %v2869_v0 }
  0xa8   : > { %1218 = vmatpush1.bf16.msra.mxu1 %v2686_v37  ;;  %1507 = vmatpush1.bf16.msra.mxu0 %v3158_v38  ;;  %v277_v37 = vld [vmem:[%s3070_s4 + $0x1c8] sm:$0xff] }
  0xa9   : > { %2291 = vmatprep.subr.bf16.mxu1 %v2869_v0  ;;  %1765 = vmatprep.subr.bf16.mxu0 %v2869_v0  ;;  %v631_v41 = vpack.c.bf16 %v277_v37, %v271_v35  ;;  %v653_v37 = vpack.c.bf16 %v323_v27, %v317_v25  ;;  %v383_v25 = vld [vmem:[%s3070_s4 + $0x518] sm:$0xff] }
  0xaa   : > { %v379_v27 = vld [vmem:[%s3070_s4 + $0x4f8] sm:$0xff] }
  0xab   : > { %1220 = vmatmul.mubr.bf16.vlgmr.msra.gmra.mrb[0].mxu1 %v604_v45  ;;  %1509 = vmatmul.mubr.bf16.vlgmr.msra.gmra.mrb[0].mxu0 %v606_v48  ;;  %v276_v45 = vld [vmem:[%s3070_s4 + $0x1c0] sm:$0xff]  ;;  %v2695_v48 = vld [vmem:[#allocation5 + $0x138] sm:$0xff]  }
  0xac   : > { %2307 = vmatpush1.bf16.msra.mxu1 %v3082_v2  ;;  %1766 = vmatpush1.bf16.msra.mxu0 %v2688_v49  ;;  %v2690_v2 = vld [vmem:[#allocation5 + $0x110] sm:$0xff]   ;;  %v283_v49 = vld [vmem:[%s3070_s4 + $0x1f8] sm:$0xff] }
  0xad   : > { %1227 = vmatprep.mubr.bf16.mxu1 %v611_v50  ;;  %1516 = vmatprep.mubr.bf16.mxu0 %v613_v51  ;;  %v289_v50 = vld [vmem:[%s3070_s4 + $0x228] sm:$0xff]  ;;  %v630_v51 = vpack.c.bf16 %v276_v45, %v270_v44  ;;  %v2703_v44 = vld [vmem:[#allocation5 + $0x178] sm:$0xff]  }
  0xae   : > { %1767 = vmatprep.subr.bf16.mxu0 %v2869_v0  ;;  %2292 = vmatprep.subr.bf16.mxu1 %v2869_v0  ;;  %v637_v53 = vpack.c.bf16 %v289_v50, %v283_v49  ;;  %v331_v45 = vld [vmem:[%s3070_s4 + $0x378] sm:$0xff]  ;;  %v328_v50 = vld [vmem:[%s3070_s4 + $0x360] sm:$0xff] }
  0xaf   : > { %v661_v49 = vpack.c.bf16 %v337_v46, %v331_v45 }
  0xb0   : > { %2308 = vmatpush1.bf16.msra.mxu1 %v3086_v4  ;;  %1768 = vmatpush1.bf16.msra.mxu0 %v2689_v56  ;;  %v2691_v4 = vld [vmem:[#allocation5 + $0x118] sm:$0xff]   ;;  %v282_v56 = vld [vmem:[%s3070_s4 + $0x1f0] sm:$0xff] }
  0xb1   : > { %2293 = vmatprep.subr.bf16.mxu1 %v2869_v0  ;;  %1769 = vmatprep.subr.bf16.mxu0 %v2869_v0 }
  0xb3   : > { %1228 = vmatmul.mubr.bf16.gmra.mrb[4].mxu1 %v610_v61  ;;  %1517 = vmatmul.mubr.bf16.gmra.mrb[4].mxu0 %v612_v62  ;;  %v295_v61 = vld [vmem:[%s3070_s4 + $0x258] sm:$0xff]  ;;  %v301_v62 = vld [vmem:[%s3070_s4 + $0x288] sm:$0xff] }
  0xb4   : > { %1235 = vmatprep.mubr.bf16.mxu1 %v617_v63  ;;  %1524 = vmatprep.mubr.bf16.mxu0 %v619_v1  ;;  %v636_v63 = vpack.c.bf16 %v288_v57, %v282_v56  ;;  %v641_v1 = vpack.c.bf16 %v299_v59, %v293_v58  ;;  %v340_v57 = vld [vmem:[%s3070_s4 + $0x3c0] sm:$0xff]  ;;  %v346_v58 = vld [vmem:[%s3070_s4 + $0x3f0] sm:$0xff] }
  0xb5   : > { %1770 = vmatpush1.bf16.msra.mxu0 %v2690_v2  ;;  %2309 = vmatpush1.bf16.msra.mxu1 %v3091_v6  ;;  %v262_v6 = vld [vmem:[%s3070_s4 + $0x150] sm:$0xff]  ;;  %v643_v2 = vpack.c.bf16 %v301_v62, %v295_v61  ;;  %v353_v61 = vld [vmem:[%s3070_s4 + $0x428] sm:$0xff]  ;;  %v359_v62 = vld [vmem:[%s3070_s4 + $0x458] sm:$0xff] }
  0xb6   : > { %1771 = vmatprep.subr.bf16.mxu0 %v2869_v0  ;;  %2294 = vmatprep.subr.bf16.mxu1 %v2869_v0  ;;  %v342_v59 = vld [vmem:[%s3070_s4 + $0x3d0] sm:$0xff] }
  0xb9   : > { %1772 = vmatpush1.bf16.msra.mxu0 %v2691_v4  ;;  %2310 = vmatpush1.bf16.msra.mxu1 %v3096_v8  ;;  %v622_v8 = vpack.c.bf16 %v262_v6, %v256_v24  ;;  %v2699_v4 = vld [vmem:[#allocation5 + $0x158] sm:$0xff]   ;;  %v306_v24 = vld [vmem:[%s3070_s4 + $0x2b0] sm:$0xff]  ;;  %v312_v6 = vld [vmem:[%s3070_s4 + $0x2e0] sm:$0xff] }
  0xba   : > { %1773 = vmatprep.subr.bf16.mxu0 %v2869_v0  ;;  %2295 = vmatprep.subr.bf16.mxu1 %v2869_v0  ;;  %v648_v35 = vpack.c.bf16 %v312_v6, %v306_v24  ;;  %v372_v24 = vld [vmem:[%s3070_s4 + $0x4c0] sm:$0xff]  ;;  %v377_v6 = vld [vmem:[%s3070_s4 + $0x4e8] sm:$0xff] }
  0xbb   : > { %1236 = vmatmul.mubr.bf16.gmra.mrb[8].mxu1 %v616_v19  ;;  %1525 = vmatmul.mubr.bf16.gmra.mrb[8].mxu0 %v618_v20  ;;  %v642_v19 = vpack.c.bf16 %v300_v9, %v294_v7  ;;  %v647_v20 = vpack.c.bf16 %v311_v13, %v305_v11  ;;  %v358_v7 = vld [vmem:[%s3070_s4 + $0x450] sm:$0xff]  ;;  %v360_v11 = vld [vmem:[%s3070_s4 + $0x460] sm:$0xff]  ;;  %v365_v13 = vld [vmem:[%s3070_s4 + $0x488] sm:$0xff] }
  0xbc   : > { %1243 = vmatprep.mubr.bf16.mxu1 %v623_v21  ;;  %1532 = vmatprep.mubr.bf16.mxu0 %v625_v22  ;;  %v649_v21 = vpack.c.bf16 %v313_v17, %v307_v15  ;;  %v2700_v22 = vld [vmem:[#allocation5 + $0x160] sm:$0xff]   ;;  %v354_v9 = vld [vmem:[%s3070_s4 + $0x430] sm:$0xff]  ;;  %v367_v15 = vld [vmem:[%s3070_s4 + $0x498] sm:$0xff] }
  0xbd   : > { %1774 = vmatpush1.bf16.msra.mxu0 %v2692_v23  ;;  %2311 = vmatpush1.bf16.msra.mxu1 %v3101_v10  ;;  %v268_v10 = vld [vmem:[%s3070_s4 + $0x180] sm:$0xff]  ;;  %v310_v23 = vld [vmem:[%s3070_s4 + $0x2d0] sm:$0xff]  ;;  %v373_v17 = vld [vmem:[%s3070_s4 + $0x4c8] sm:$0xff] }
  0xbe   : > { %1775 = vmatprep.subr.bf16.mxu0 %v2869_v0  ;;  %2296 = vmatprep.subr.bf16.mxu1 %v2869_v0 }
  0xc1   : > { %1776 = vmatpush1.bf16.msra.mxu0 %v2693_v33  ;;  %2312 = vmatpush1.bf16.msra.mxu1 %v3106_v12  ;;  %v628_v12 = vpack.c.bf16 %v274_v43, %v268_v10  ;;  %v325_v33 = vld [vmem:[%s3070_s4 + $0x348] sm:$0xff]  ;;  %v335_v43 = vld [vmem:[%s3070_s4 + $0x398] sm:$0xff] }
  0xc2   : > { %1777 = vmatprep.subr.bf16.mxu0 %v2869_v0  ;;  %2297 = vmatprep.subr.bf16.mxu1 %v2869_v0  ;;  %v329_v10 = vld [vmem:[%s3070_s4 + $0x368] sm:$0xff] }
  0xc3   : > { %1244 = vmatmul.mubr.bf16.gmra.mrb[12].mxu1 %v622_v8  ;;  %1533 = vmatmul.mubr.bf16.gmra.mrb[12].mxu0 %v624_v39  ;;  %v655_v8 = vpack.c.bf16 %v325_v33, %v319_v31  ;;  %v2702_v39 = vld [vmem:[#allocation5 + $0x170] sm:$0xff]  }
  0xc4   : > { %1251 = vmatprep.mubr.bf16.mxu1 %v629_v40  ;;  %1540 = vmatprep.mubr.bf16.mxu0 %v631_v41  ;;  %v322_v40 = vld [vmem:[%s3070_s4 + $0x330] sm:$0xff] }
  0xc5   : > { %1778 = vmatpush1.bf16.msra.mxu0 %v2694_v42  ;;  %2313 = vmatpush1.bf16.msra.mxu1 %v3111_v14  ;;  %v280_v14 = vld [vmem:[%s3070_s4 + $0x1e0] sm:$0xff]  ;;  %v318_v41 = vld [vmem:[%s3070_s4 + $0x310] sm:$0xff] }
  0xc6   : > { %1779 = vmatprep.subr.bf16.mxu0 %v2869_v0  ;;  %2298 = vmatprep.subr.bf16.mxu1 %v2869_v0  ;;  %v324_v42 = vld [vmem:[%s3070_s4 + $0x340] sm:$0xff] }
  0xc7   : > { %v654_v47 = vpack.c.bf16 %v324_v42, %v318_v41  ;;  %v395_v41 = vld [vmem:[%s3070_s4 + $0x578] sm:$0xff] }
  0xc8   : > { %v391_v42 = vld [vmem:[%s3070_s4 + $0x558] sm:$0xff] }
  0xc9   : > { %1780 = vmatpush1.bf16.msra.mxu0 %v2695_v48  ;;  %2314 = vmatpush1.bf16.msra.mxu1 %v3116_v16  ;;  %v634_v16 = vpack.c.bf16 %v286_v55, %v280_v14  ;;  %v659_v48 = vpack.c.bf16 %v335_v43, %v329_v10  ;;  %v397_v10 = vld [vmem:[%s3070_s4 + $0x588] sm:$0xff] }
  0xca   : > { %1781 = vmatprep.subr.bf16.mxu0 %v2869_v0  ;;  %2299 = vmatprep.subr.bf16.mxu1 %v2869_v0  ;;  %v691_v46 = vpack.c.bf16 %v397_v10, %v391_v42 }
  0xcb   : > { %1252 = vmatmul.mubr.bf16.gmra.mrb[16].mxu1 %v628_v12  ;;  %1541 = vmatmul.mubr.bf16.gmra.mrb[16].mxu0 %v630_v51  ;;  %v334_v12 = vld [vmem:[%s3070_s4 + $0x390] sm:$0xff]  ;;  %v336_v51 = vld [vmem:[%s3070_s4 + $0x3a0] sm:$0xff] }
  0xcc   : > { %1259 = vmatprep.mubr.bf16.mxu1 %v635_v52  ;;  %1548 = vmatprep.mubr.bf16.mxu0 %v637_v53  ;;  %v347_v52 = vld [vmem:[%s3070_s4 + $0x3f8] sm:$0xff] }
  0xcd   : > { %1782 = vmatpush1.bf16.msra.mxu0 %v2696_v54  ;;  %2315 = vmatpush1.bf16.msra.mxu1 %v3121_v18  ;;  %v292_v18 = vld [vmem:[%s3070_s4 + $0x240] sm:$0xff]  ;;  %v343_v53 = vld [vmem:[%s3070_s4 + $0x3d8] sm:$0xff]  ;;  %v349_v54 = vld [vmem:[%s3070_s4 + $0x408] sm:$0xff] }
  0xce   : > { %1783 = vmatprep.subr.bf16.mxu0 %v2869_v0  ;;  %2300 = vmatprep.subr.bf16.mxu1 %v2869_v0  ;;  %v667_v56 = vpack.c.bf16 %v349_v54, %v343_v53 }
  0xd1   : > { %1784 = vmatpush1.bf16.msra.mxu0 %v2697_v60  ;;  %2316 = vmatpush1.bf16.msra.mxu1 %v3130_v26  ;;  %v640_v26 = vpack.c.bf16 %v298_v5, %v292_v18  ;;  %v348_v60 = vld [vmem:[%s3070_s4 + $0x400] sm:$0xff] }
  0xd2   : > { %1785 = vmatprep.subr.bf16.mxu0 %v2869_v0  ;;  %2301 = vmatprep.subr.bf16.mxu1 %v2869_v0  ;;  %v352_v5 = vld [vmem:[%s3070_s4 + $0x420] sm:$0xff] }
  0xd3   : > { %1260 = vmatmul.mubr.bf16.gmra.mrb[20].mxu1 %v634_v16  ;;  %1549 = vmatmul.mubr.bf16.gmra.mrb[20].mxu0 %v636_v63  ;;  %v355_v16 = vld [vmem:[%s3070_s4 + $0x438] sm:$0xff]  ;;  %v361_v63 = vld [vmem:[%s3070_s4 + $0x468] sm:$0xff] }
  0xd4   : > { %1267 = vmatprep.mubr.bf16.mxu1 %v641_v1  ;;  %1556 = vmatprep.mubr.bf16.mxu0 %v643_v2  ;;  %v664_v1 = vpack.c.bf16 %v346_v58, %v340_v57  ;;  %v666_v2 = vpack.c.bf16 %v348_v60, %v342_v59  ;;  %v673_v18 = vpack.c.bf16 %v361_v63, %v355_v16  ;;  %v413_v57 = vld [vmem:[%s3070_s4 + $0x608] sm:$0xff]  ;;  %v419_v58 = vld [vmem:[%s3070_s4 + $0x638] sm:$0xff] }
  0xd5   : > { %1786 = vmatpush1.bf16.msra.mxu0 %v2698_v3  ;;  %2317 = vmatpush1.bf16.msra.mxu1 %v3135_v28  ;;  %v304_v28 = vld [vmem:[%s3070_s4 + $0x2a0] sm:$0xff]  ;;  %v671_v3 = vpack.c.bf16 %v359_v62, %v353_v61  ;;  %v225_v59 = vld [vmem:[%s3070_s4 + $0x28] sm:$0xff]  ;;  %v231_v60 = vld [vmem:[%s3070_s4 + $0x58] sm:$0xff]  ;;  %v701_v16 = vpack.c.bf16 %v419_v58, %v413_v57 }
  0xd6   : > { %1787 = vmatprep.subr.bf16.mxu0 %v2869_v0  ;;  %2302 = vmatprep.subr.bf16.mxu1 %v2869_v0  ;;  %v609_v63 = vpack.c.bf16 %v231_v60, %v225_v59 }
  0xd9   : > { %1788 = vmatpush1.bf16.msra.mxu0 %v2699_v4  ;;  %2318 = vmatpush1.bf16.msra.mxu1 %v3140_v30  ;;  %v646_v30 = vpack.c.bf16 %v310_v23, %v304_v28  ;;  %v371_v4 = vld [vmem:[%s3070_s4 + $0x4b8] sm:$0xff]  ;;  %v370_v28 = vld [vmem:[%s3070_s4 + $0x4b0] sm:$0xff] }
  0xda   : > { %1789 = vmatprep.subr.bf16.mxu0 %v2869_v0  ;;  %2303 = vmatprep.subr.bf16.mxu1 %v2869_v0  ;;  %v366_v23 = vld [vmem:[%s3070_s4 + $0x490] sm:$0xff] }
  0xdb   : > { %1268 = vmatmul.mubr.bf16.gmra.mrb[24].mxu1 %v640_v26  ;;  %1557 = vmatmul.mubr.bf16.gmra.mrb[24].mxu0 %v642_v19  ;;  %v670_v26 = vpack.c.bf16 %v358_v7, %v352_v5  ;;  %v672_v19 = vpack.c.bf16 %v360_v11, %v354_v9  ;;  %v678_v33 = vpack.c.bf16 %v372_v24, %v366_v23  ;;  %v425_v5 = vld [vmem:[%s3070_s4 + $0x668] sm:$0xff]  ;;  %v431_v7 = vld [vmem:[%s3070_s4 + $0x698] sm:$0xff] }
  0xdc   : > { %1275 = vmatprep.mubr.bf16.mxu1 %v647_v20  ;;  %1564 = vmatprep.mubr.bf16.mxu0 %v649_v21  ;;  %v677_v20 = vpack.c.bf16 %v371_v4, %v365_v13  ;;  %v679_v21 = vpack.c.bf16 %v373_v17, %v367_v15  ;;  %v237_v9 = vld [vmem:[%s3070_s4 + $0x88] sm:$0xff]  ;;  %v243_v11 = vld [vmem:[%s3070_s4 + $0xb8] sm:$0xff]  ;;  %v707_v15 = vpack.c.bf16 %v431_v7, %v425_v5 }
  0xdd   : > { %1790 = vmatpush1.bf16.msra.mxu0 %v2700_v22  ;;  %2319 = vmatpush1.bf16.msra.mxu1 %v3145_v32  ;;  %v316_v32 = vld [vmem:[%s3070_s4 + $0x300] sm:$0xff]  ;;  %v615_v17 = vpack.c.bf16 %v243_v11, %v237_v9  ;;  %v249_v23 = vld [vmem:[%s3070_s4 + $0xe8] sm:$0xff]  ;;  %v255_v24 = vld [vmem:[%s3070_s4 + $0x118] sm:$0xff] }
  0xde   : > { %1791 = vmatprep.subr.bf16.mxu0 %v2869_v0  ;;  %2304 = vmatprep.subr.bf16.mxu1 %v2869_v0  ;;  %v364_v22 = vld [vmem:[%s3070_s4 + $0x480] sm:$0xff] }
  0xdf   : > { %v676_v31 = vpack.c.bf16 %v370_v28, %v364_v22  ;;  %v437_v22 = vld [vmem:[%s3070_s4 + $0x6c8] sm:$0xff]  ;;  %v443_v28 = vld [vmem:[%s3070_s4 + $0x6f8] sm:$0xff] }
  0xe1   : > { %1792 = vmatpush1.bf16.msra.mxu0 %v2701_v29  ;;  %2320 = vmatpush1.bf16.msra.mxu1 %v3150_v34  ;;  %v652_v34 = vpack.c.bf16 %v322_v40, %v316_v32  ;;  %v385_v29 = vld [vmem:[%s3070_s4 + $0x528] sm:$0xff]  ;;  %v384_v32 = vld [vmem:[%s3070_s4 + $0x520] sm:$0xff] }
  0xe2   : > { %1793 = vmatprep.subr.bf16.mxu0 %v2869_v0  ;;  %2305 = vmatprep.subr.bf16.mxu1 %v2869_v0  ;;  %v389_v40 = vld [vmem:[%s3070_s4 + $0x548] sm:$0xff] }
  0xe3   : > { %1276 = vmatmul.mubr.bf16.gmra.mrb[28].mxu1 %v646_v30  ;;  %1565 = vmatmul.mubr.bf16.gmra.mrb[28].mxu0 %v648_v35  ;;  %v683_v30 = vpack.c.bf16 %v383_v25, %v377_v6  ;;  %v685_v35 = vpack.c.bf16 %v385_v29, %v379_v27  ;;  %v689_v45 = vpack.c.bf16 %v395_v41, %v389_v40 }
  0xe4   : > { %1283 = vmatprep.mubr.bf16.mxu1 %v653_v37  ;;  %1572 = vmatprep.mubr.bf16.mxu0 %v655_v8  ;;  %v376_v37 = vld [vmem:[%s3070_s4 + $0x4e0] sm:$0xff]  ;;  %v382_v8 = vld [vmem:[%s3070_s4 + $0x510] sm:$0xff]  ;;  %v713_v27 = vpack.c.bf16 %v443_v28, %v437_v22  ;;  %v621_v29 = vpack.c.bf16 %v255_v24, %v249_v23 }
  0xe5   : > { %1794 = vmatpush1.bf16.msra.mxu0 %v2702_v39  ;;  %2321 = vmatpush1.bf16.msra.mxu1 %v3155_v36  ;;  %v330_v36 = vld [vmem:[%s3070_s4 + $0x370] sm:$0xff]  ;;  %v682_v43 = vpack.c.bf16 %v382_v8, %v376_v37  ;;  %v449_v37 = vld [vmem:[%s3070_s4 + $0x728] sm:$0xff]  ;;  %v455_v8 = vld [vmem:[%s3070_s4 + $0x758] sm:$0xff] }
  0xe6   : > { %1795 = vmatprep.subr.bf16.mxu0 %v2869_v0  ;;  %2306 = vmatprep.subr.bf16.mxu1 %v2869_v0  ;;  %v341_v0 = vld [vmem:[%s3070_s4 + $0x3c8] sm:$0xff]  ;;  %v660_v14 = vpack.c.bf16 %v336_v51, %v330_v36  ;;  %v378_v39 = vld [vmem:[%s3070_s4 + $0x4f0] sm:$0xff]  ;;  %v403_v36 = vld [vmem:[%s3070_s4 + $0x5b8] sm:$0xff]  ;;  %v719_v42 = vpack.c.bf16 %v455_v8, %v449_v37 }
  0xe7   : > { %v665_v55 = vpack.c.bf16 %v347_v52, %v341_v0  ;;  %v409_v51 = vld [vmem:[%s3070_s4 + $0x5e8] sm:$0xff] }
  0xe8   : > { %v697_v54 = vpack.c.bf16 %v409_v51, %v403_v36 }
  0xe9   : > { %1796 = vmatpush1.bf16.msra.mxu0 %v2703_v44  ;;  %2322 = vmatpush1.bf16.msra.mxu1 %v3158_v38  ;;  %v658_v38 = vpack.c.bf16 %v334_v12, %v328_v50  ;;  %v684_v44 = vpack.c.bf16 %v384_v32, %v378_v39  ;;  %v401_v50 = vld [vmem:[%s3070_s4 + $0x5a8] sm:$0xff]  ;;  %v407_v12 = vld [vmem:[%s3070_s4 + $0x5d8] sm:$0xff] }
  0xea   : > { %v695_v53 = vpack.c.bf16 %v407_v12, %v401_v50  ;;  %v261_v39 = vld [vmem:[%s3070_s4 + $0x148] sm:$0xff]  ;;  %v267_v32 = vld [vmem:[%s3070_s4 + $0x178] sm:$0xff] }
  0xeb   : > { %1284 = vmatmul.mubr.bf16.gmra.mrb[32].mxu1 %v652_v34  ;;  %1573 = vmatmul.mubr.bf16.gmra.mrb[32].mxu0 %v654_v47  ;;  %v388_v34 = vld [vmem:[%s3070_s4 + $0x540] sm:$0xff]  ;;  %v394_v47 = vld [vmem:[%s3070_s4 + $0x570] sm:$0xff]  ;;  %v627_v10 = vpack.c.bf16 %v267_v32, %v261_v39 }
  0xec   : > { %1291 = vmatprep.mubr.bf16.mxu1 %v659_v48  ;;  %1580 = vmatprep.mubr.bf16.mxu0 %v661_v49  ;;  %v390_v48 = vld [vmem:[%s3070_s4 + $0x550] sm:$0xff]  ;;  %v396_v49 = vld [vmem:[%s3070_s4 + $0x580] sm:$0xff]  ;;  %v688_v0 = vpack.c.bf16 %v394_v47, %v388_v34  ;;  %v461_v34 = vld [vmem:[%s3070_s4 + $0x788] sm:$0xff] }
  0xed   : > { %v690_v52 = vpack.c.bf16 %v396_v49, %v390_v48  ;;  %v467_v47 = vld [vmem:[%s3070_s4 + $0x7b8] sm:$0xff]  ;;  %v273_v48 = vld [vmem:[%s3070_s4 + $0x1a8] sm:$0xff] }
  0xee   : > { %v279_v49 = vld [vmem:[%s3070_s4 + $0x1d8] sm:$0xff]  ;;  %v725_v36 = vpack.c.bf16 %v467_v47, %v461_v34 }
  0xef   : > { %v633_v51 = vpack.c.bf16 %v279_v49, %v273_v48 }
  0xf3   : > { %1292 = vmatmul.mubr.bf16.gmra.mrb[36].mxu1 %v658_v38  ;;  %1581 = vmatmul.mubr.bf16.gmra.mrb[36].mxu0 %v660_v14  ;;  %v400_v38 = vld [vmem:[%s3070_s4 + $0x5a0] sm:$0xff]  ;;  %v406_v14 = vld [vmem:[%s3070_s4 + $0x5d0] sm:$0xff] }
  0xf4   : > { %1299 = vmatprep.mubr.bf16.mxu1 %v665_v55  ;;  %1588 = vmatprep.mubr.bf16.mxu0 %v667_v56  ;;  %v402_v55 = vld [vmem:[%s3070_s4 + $0x5b0] sm:$0xff]  ;;  %v408_v56 = vld [vmem:[%s3070_s4 + $0x5e0] sm:$0xff]  ;;  %v694_v61 = vpack.c.bf16 %v406_v14, %v400_v38  ;;  %v473_v38 = vld [vmem:[%s3070_s4 + $0x7e8] sm:$0xff] }
  0xf5   : > { %v696_v62 = vpack.c.bf16 %v408_v56, %v402_v55  ;;  %v479_v14 = vld [vmem:[%s3070_s4 + $0x818] sm:$0xff]  ;;  %v285_v55 = vld [vmem:[%s3070_s4 + $0x208] sm:$0xff] }
  0xf6   : > { %v291_v56 = vld [vmem:[%s3070_s4 + $0x238] sm:$0xff]  ;;  %v731_v59 = vpack.c.bf16 %v479_v14, %v473_v38 }
  0xf7   : > { %v639_v60 = vpack.c.bf16 %v291_v56, %v285_v55 }
  0xfb   : > { %1300 = vmatmul.mubr.bf16.gmra.mrb[40].mxu1 %v664_v1  ;;  %1589 = vmatmul.mubr.bf16.gmra.mrb[40].mxu0 %v666_v2  ;;  %v412_v1 = vld [vmem:[%s3070_s4 + $0x600] sm:$0xff]  ;;  %v418_v2 = vld [vmem:[%s3070_s4 + $0x630] sm:$0xff] }
  0xfc   : > { %1307 = vmatprep.mubr.bf16.mxu1 %v671_v3  ;;  %1596 = vmatprep.mubr.bf16.mxu0 %v673_v18  ;;  %v224_v3 = vld [vmem:[%s3070_s4 + $0x20] sm:$0xff]  ;;  %v230_v18 = vld [vmem:[%s3070_s4 + $0x50] sm:$0xff]  ;;  %v700_v13 = vpack.c.bf16 %v418_v2, %v412_v1  ;;  %v485_v1 = vld [vmem:[%s3070_s4 + $0x848] sm:$0xff] }
  0xfd   : > { %v608_v4 = vpack.c.bf16 %v230_v18, %v224_v3  ;;  %v491_v2 = vld [vmem:[%s3070_s4 + $0x878] sm:$0xff]  ;;  %v297_v3 = vld [vmem:[%s3070_s4 + $0x268] sm:$0xff] }
  0xfe   : > { %v303_v18 = vld [vmem:[%s3070_s4 + $0x298] sm:$0xff]  ;;  %v737_v9 = vpack.c.bf16 %v491_v2, %v485_v1 }
  0xff   : > { %v645_v11 = vpack.c.bf16 %v303_v18, %v297_v3 }
 0x103   : > { %1308 = vmatmul.mubr.bf16.gmra.mrb[44].mxu1 %v670_v26  ;;  %1597 = vmatmul.mubr.bf16.gmra.mrb[44].mxu0 %v672_v19  ;;  %v424_v26 = vld [vmem:[%s3070_s4 + $0x660] sm:$0xff]  ;;  %v430_v19 = vld [vmem:[%s3070_s4 + $0x690] sm:$0xff] }
 0x104   : > { %1315 = vmatprep.mubr.bf16.mxu1 %v677_v20  ;;  %1604 = vmatprep.mubr.bf16.mxu0 %v679_v21  ;;  %v236_v20 = vld [vmem:[%s3070_s4 + $0x80] sm:$0xff]  ;;  %v242_v21 = vld [vmem:[%s3070_s4 + $0xb0] sm:$0xff]  ;;  %v706_v6 = vpack.c.bf16 %v430_v19, %v424_v26  ;;  %v497_v26 = vld [vmem:[%s3070_s4 + $0x8a8] sm:$0xff] }
 0x105   : > { %v614_v25 = vpack.c.bf16 %v242_v21, %v236_v20  ;;  %v503_v19 = vld [vmem:[%s3070_s4 + $0x8d8] sm:$0xff]  ;;  %v309_v20 = vld [vmem:[%s3070_s4 + $0x2c8] sm:$0xff] }
 0x106   : > { %v315_v21 = vld [vmem:[%s3070_s4 + $0x2f8] sm:$0xff]  ;;  %v743_v23 = vpack.c.bf16 %v503_v19, %v497_v26 }
 0x107   : > { %v651_v24 = vpack.c.bf16 %v315_v21, %v309_v20  ;;  %v375_v26 = vld [vmem:[%s3070_s4 + $0x4d8] sm:$0xff] }
 0x10b   : > { %1316 = vmatmul.mubr.bf16.gmra.mrb[48].mxu1 %v676_v31  ;;  %1605 = vmatmul.mubr.bf16.gmra.mrb[48].mxu0 %v678_v33  ;;  %v436_v31 = vld [vmem:[%s3070_s4 + $0x6c0] sm:$0xff]  ;;  %v442_v33 = vld [vmem:[%s3070_s4 + $0x6f0] sm:$0xff] }
 0x10c   : > { %1323 = vmatprep.mubr.bf16.mxu1 %v683_v30  ;;  %1612 = vmatprep.mubr.bf16.mxu0 %v685_v35  ;;  %v248_v30 = vld [vmem:[%s3070_s4 + $0xe0] sm:$0xff]  ;;  %v254_v35 = vld [vmem:[%s3070_s4 + $0x110] sm:$0xff]  ;;  %v712_v40 = vpack.c.bf16 %v442_v33, %v436_v31  ;;  %v509_v31 = vld [vmem:[%s3070_s4 + $0x908] sm:$0xff] }
 0x10d   : > { %v620_v41 = vpack.c.bf16 %v254_v35, %v248_v30  ;;  %v515_v33 = vld [vmem:[%s3070_s4 + $0x938] sm:$0xff]  ;;  %v321_v30 = vld [vmem:[%s3070_s4 + $0x328] sm:$0xff] }
 0x10e   : > { %v327_v35 = vld [vmem:[%s3070_s4 + $0x358] sm:$0xff]  ;;  %v749_v39 = vpack.c.bf16 %v515_v33, %v509_v31  ;;  %v569_v31 = vld [vmem:[%s3070_s4 + $0xae8] sm:$0xff] }
 0x10f   : > { %v657_v32 = vpack.c.bf16 %v327_v35, %v321_v30  ;;  %v575_v33 = vld [vmem:[%s3070_s4 + $0xb18] sm:$0xff]  ;;  %v381_v35 = vld [vmem:[%s3070_s4 + $0x508] sm:$0xff] }
 0x113   : > { %1324 = vmatmul.mubr.bf16.gmra.mrb[52].mxu1 %v682_v43  ;;  %1613 = vmatmul.mubr.bf16.gmra.mrb[52].mxu0 %v684_v44  ;;  %v448_v43 = vld [vmem:[%s3070_s4 + $0x720] sm:$0xff]  ;;  %v454_v44 = vld [vmem:[%s3070_s4 + $0x750] sm:$0xff] }
 0x114   : > { %1331 = vmatprep.mubr.bf16.mxu1 %v689_v45  ;;  %1620 = vmatprep.mubr.bf16.mxu0 %v691_v46  ;;  %v260_v45 = vld [vmem:[%s3070_s4 + $0x140] sm:$0xff]  ;;  %v266_v46 = vld [vmem:[%s3070_s4 + $0x170] sm:$0xff]  ;;  %v718_v50 = vpack.c.bf16 %v454_v44, %v448_v43  ;;  %v521_v43 = vld [vmem:[%s3070_s4 + $0x968] sm:$0xff] }
 0x115   : > { %v626_v12 = vpack.c.bf16 %v266_v46, %v260_v45  ;;  %v527_v44 = vld [vmem:[%s3070_s4 + $0x998] sm:$0xff]  ;;  %v333_v45 = vld [vmem:[%s3070_s4 + $0x388] sm:$0xff] }
 0x116   : > { %v339_v46 = vld [vmem:[%s3070_s4 + $0x3b8] sm:$0xff]  ;;  %v755_v48 = vpack.c.bf16 %v527_v44, %v521_v43  ;;  %v568_v43 = vld [vmem:[%s3070_s4 + $0xae0] sm:$0xff]  ;;  %v574_v44 = vld [vmem:[%s3070_s4 + $0xb10] sm:$0xff] }
 0x117   : > { %v663_v49 = vpack.c.bf16 %v339_v46, %v333_v45  ;;  %v380_v45 = vld [vmem:[%s3070_s4 + $0x500] sm:$0xff]  ;;  %v386_v46 = vld [vmem:[%s3070_s4 + $0x530] sm:$0xff] }
 0x11b   : > { %1332 = vmatmul.mubr.bf16.gmra.mrb[56].mxu1 %v688_v0  ;;  %1621 = vmatmul.mubr.bf16.gmra.mrb[56].mxu0 %v690_v52  ;;  %v460_v0 = vld [vmem:[%s3070_s4 + $0x780] sm:$0xff]  ;;  %v466_v52 = vld [vmem:[%s3070_s4 + $0x7b0] sm:$0xff] }
 0x11c   : > { %1339 = vmatprep.mubr.bf16.mxu1 %v695_v53  ;;  %1628 = vmatprep.mubr.bf16.mxu0 %v697_v54  ;;  %v272_v53 = vld [vmem:[%s3070_s4 + $0x1a0] sm:$0xff]  ;;  %v278_v54 = vld [vmem:[%s3070_s4 + $0x1d0] sm:$0xff]  ;;  %v724_v57 = vpack.c.bf16 %v466_v52, %v460_v0  ;;  %v533_v0 = vld [vmem:[%s3070_s4 + $0x9c8] sm:$0xff] }
 0x11d   : > { %v632_v58 = vpack.c.bf16 %v278_v54, %v272_v53  ;;  %v539_v52 = vld [vmem:[%s3070_s4 + $0x9f8] sm:$0xff]  ;;  %v345_v53 = vld [vmem:[%s3070_s4 + $0x3e8] sm:$0xff] }
 0x11e   : > { %v351_v54 = vld [vmem:[%s3070_s4 + $0x418] sm:$0xff]  ;;  %v761_v55 = vpack.c.bf16 %v539_v52, %v533_v0  ;;  %v686_v0 = vpack.c.bf16 %v386_v46, %v380_v45 }
 0x11f   : > { %v669_v56 = vpack.c.bf16 %v351_v54, %v345_v53 }
 0x123   : > { %1340 = vmatmul.mubr.bf16.gmra.mrb[60].mxu1 %v694_v61  ;;  %1629 = vmatmul.mubr.bf16.gmra.mrb[60].mxu0 %v696_v62  ;;  %v472_v61 = vld [vmem:[%s3070_s4 + $0x7e0] sm:$0xff]  ;;  %v478_v62 = vld [vmem:[%s3070_s4 + $0x810] sm:$0xff] }
 0x124   : > { %1347 = vmatprep.mubr.bf16.mxu1 %v701_v16  ;;  %1797 = vmatprep.mubr.bf16.mxu0 %v609_v63  ;;  %v284_v16 = vld [vmem:[%s3070_s4 + $0x200] sm:$0xff]  ;;  %v290_v63 = vld [vmem:[%s3070_s4 + $0x230] sm:$0xff]  ;;  %v730_v5 = vpack.c.bf16 %v478_v62, %v472_v61  ;;  %v545_v61 = vld [vmem:[%s3070_s4 + $0xa28] sm:$0xff] }
 0x125   : > { %v638_v7 = vpack.c.bf16 %v290_v63, %v284_v16  ;;  %v551_v62 = vld [vmem:[%s3070_s4 + $0xa58] sm:$0xff]  ;;  %v357_v16 = vld [vmem:[%s3070_s4 + $0x448] sm:$0xff] }
 0x126   : > { %v363_v63 = vld [vmem:[%s3070_s4 + $0x478] sm:$0xff]  ;;  %v767_v3 = vpack.c.bf16 %v551_v62, %v545_v61 }
 0x127   : > { %v675_v18 = vpack.c.bf16 %v363_v63, %v357_v16  ;;  %v411_v61 = vld [vmem:[%s3070_s4 + $0x5f8] sm:$0xff] }
 0x12b   : > { %1348 = vmatmul.mubr.bf16.gmra.mrb[64].mxu1 %v700_v13  ;;  %1798 = vmatmul.mubr.bf16.vlgmr.msra.gmra.mrb[0].mxu0 %v608_v4  ;;  %v484_v13 = vld [vmem:[%s3070_s4 + $0x840] sm:$0xff]  ;;  %v490_v4 = vld [vmem:[%s3070_s4 + $0x870] sm:$0xff] }
 0x12c   : > { %1355 = vmatprep.mubr.bf16.mxu1 %v707_v15  ;;  %1805 = vmatprep.mubr.bf16.mxu0 %v615_v17  ;;  %v296_v15 = vld [vmem:[%s3070_s4 + $0x260] sm:$0xff]  ;;  %v302_v17 = vld [vmem:[%s3070_s4 + $0x290] sm:$0xff]  ;;  %v736_v22 = vpack.c.bf16 %v490_v4, %v484_v13  ;;  %v557_v13 = vld [vmem:[%s3070_s4 + $0xa88] sm:$0xff] }
 0x12d   : > { %v644_v28 = vpack.c.bf16 %v302_v17, %v296_v15  ;;  %v563_v4 = vld [vmem:[%s3070_s4 + $0xab8] sm:$0xff]  ;;  %v369_v17 = vld [vmem:[%s3070_s4 + $0x4a8] sm:$0xff] }
 0x133   : > { %1356 = vmatmul.mubr.bf16.gmra.mrb[68].mxu1 %v706_v6  ;;  %1806 = vmatmul.mubr.bf16.gmra.mrb[4].mxu0 %v614_v25  ;;  %v496_v6 = vld [vmem:[%s3070_s4 + $0x8a0] sm:$0xff]  ;;  %v502_v25 = vld [vmem:[%s3070_s4 + $0x8d0] sm:$0xff] }
 0x134   : > { %1363 = vmatprep.mubr.bf16.mxu1 %v713_v27  ;;  %1813 = vmatprep.mubr.bf16.mxu0 %v621_v29  ;;  %v308_v27 = vld [vmem:[%s3070_s4 + $0x2c0] sm:$0xff]  ;;  %v314_v29 = vld [vmem:[%s3070_s4 + $0x2f0] sm:$0xff]  ;;  %v742_v37 = vpack.c.bf16 %v502_v25, %v496_v6 }
 0x135   : > { %v650_v8 = vpack.c.bf16 %v314_v29, %v308_v27  ;;  %v556_v6 = vld [vmem:[%s3070_s4 + $0xa80] sm:$0xff]  ;;  %v562_v25 = vld [vmem:[%s3070_s4 + $0xab0] sm:$0xff] }
 0x136   : > { %v368_v27 = vld [vmem:[%s3070_s4 + $0x4a0] sm:$0xff]  ;;  %v374_v29 = vld [vmem:[%s3070_s4 + $0x4d0] sm:$0xff] }
 0x13b   : > { %1364 = vmatmul.mubr.bf16.gmra.mrb[72].mxu1 %v712_v40  ;;  %1814 = vmatmul.mubr.bf16.gmra.mrb[8].mxu0 %v620_v41  ;;  %v508_v40 = vld [vmem:[%s3070_s4 + $0x900] sm:$0xff]  ;;  %v514_v41 = vld [vmem:[%s3070_s4 + $0x930] sm:$0xff] }
 0x13c   : > { %1371 = vmatprep.mubr.bf16.mxu1 %v719_v42  ;;  %1821 = vmatprep.mubr.bf16.mxu0 %v627_v10  ;;  %v320_v42 = vld [vmem:[%s3070_s4 + $0x320] sm:$0xff]  ;;  %v326_v10 = vld [vmem:[%s3070_s4 + $0x350] sm:$0xff]  ;;  %v748_v34 = vpack.c.bf16 %v514_v41, %v508_v40  ;;  %v680_v40 = vpack.c.bf16 %v374_v29, %v368_v27  ;;  %v779_v41 = vpack.c.bf16 %v575_v33, %v569_v31 }
 0x13d   : > { %v656_v47 = vpack.c.bf16 %v326_v10, %v320_v42  ;;  %v414_v27 = vld [vmem:[%s3070_s4 + $0x610] sm:$0xff]  ;;  %v420_v29 = vld [vmem:[%s3070_s4 + $0x640] sm:$0xff] }
 0x13e   : > { %v416_v31 = vld [vmem:[%s3070_s4 + $0x620] sm:$0xff]  ;;  %v422_v33 = vld [vmem:[%s3070_s4 + $0x650] sm:$0xff] }
 0x143   : > { %1372 = vmatmul.mubr.bf16.gmra.mrb[76].mxu1 %v718_v50  ;;  %1822 = vmatmul.mubr.bf16.gmra.mrb[12].mxu0 %v626_v12  ;;  %v520_v50 = vld [vmem:[%s3070_s4 + $0x960] sm:$0xff]  ;;  %v526_v12 = vld [vmem:[%s3070_s4 + $0x990] sm:$0xff] }
 0x144   : > { %1379 = vmatprep.mubr.bf16.mxu1 %v725_v36  ;;  %1829 = vmatprep.mubr.bf16.mxu0 %v633_v51  ;;  %v332_v36 = vld [vmem:[%s3070_s4 + $0x380] sm:$0xff]  ;;  %v338_v51 = vld [vmem:[%s3070_s4 + $0x3b0] sm:$0xff]  ;;  %v754_v38 = vpack.c.bf16 %v526_v12, %v520_v50  ;;  %v399_v50 = vld [vmem:[%s3070_s4 + $0x598] sm:$0xff] }
 0x145   : > { %v662_v14 = vpack.c.bf16 %v338_v51, %v332_v36  ;;  %v778_v36 = vpack.c.bf16 %v574_v44, %v568_v43  ;;  %v704_v43 = vpack.c.bf16 %v422_v33, %v416_v31  ;;  %v471_v31 = vld [vmem:[%s3070_s4 + $0x7d8] sm:$0xff] }
 0x14b   : > { %1380 = vmatmul.mubr.bf16.gmra.mrb[80].mxu1 %v724_v57  ;;  %1830 = vmatmul.mubr.bf16.gmra.mrb[16].mxu0 %v632_v58  ;;  %v532_v57 = vld [vmem:[%s3070_s4 + $0x9c0] sm:$0xff]  ;;  %v538_v58 = vld [vmem:[%s3070_s4 + $0x9f0] sm:$0xff] }
 0x14c   : > { %1387 = vmatprep.mubr.bf16.mxu1 %v731_v59  ;;  %1837 = vmatprep.mubr.bf16.mxu0 %v639_v60  ;;  %v344_v59 = vld [vmem:[%s3070_s4 + $0x3e0] sm:$0xff]  ;;  %v350_v60 = vld [vmem:[%s3070_s4 + $0x410] sm:$0xff]  ;;  %v760_v1 = vpack.c.bf16 %v538_v58, %v532_v57  ;;  %v593_v57 = vld [vmem:[%s3070_s4 + $0xba8] sm:$0xff] }
 0x14d   : > { %v668_v2 = vpack.c.bf16 %v350_v60, %v344_v59  ;;  %v599_v58 = vld [vmem:[%s3070_s4 + $0xbd8] sm:$0xff]  ;;  %v405_v60 = vld [vmem:[%s3070_s4 + $0x5c8] sm:$0xff] }
 0x153   : > { %1388 = vmatmul.mubr.bf16.gmra.mrb[84].mxu1 %v730_v5  ;;  %1838 = vmatmul.mubr.bf16.gmra.mrb[20].mxu0 %v638_v7  ;;  %v544_v5 = vld [vmem:[%s3070_s4 + $0xa20] sm:$0xff]  ;;  %v550_v7 = vld [vmem:[%s3070_s4 + $0xa50] sm:$0xff] }
 0x154   : > { %1395 = vmatprep.mubr.bf16.mxu1 %v737_v9  ;;  %1845 = vmatprep.mubr.bf16.mxu0 %v645_v11  ;;  %v356_v9 = vld [vmem:[%s3070_s4 + $0x440] sm:$0xff]  ;;  %v362_v11 = vld [vmem:[%s3070_s4 + $0x470] sm:$0xff]  ;;  %v766_v20 = vpack.c.bf16 %v550_v7, %v544_v5 }
 0x155   : > { %v592_v5 = vld [vmem:[%s3070_s4 + $0xba0] sm:$0xff]  ;;  %v598_v7 = vld [vmem:[%s3070_s4 + $0xbd0] sm:$0xff] }
 0x15b   : > { %1396 = vmatmul.mubr.bf16.gmra.mrb[88].mxu1 %v736_v22  ;;  %1846 = vmatmul.mubr.bf16.gmra.mrb[24].mxu0 %v644_v28  ;;  %v674_v22 = vpack.c.bf16 %v362_v11, %v356_v9  ;;  %v773_v28 = vpack.c.bf16 %v563_v4, %v557_v13  ;;  %v404_v9 = vld [vmem:[%s3070_s4 + $0x5c0] sm:$0xff]  ;;  %v410_v11 = vld [vmem:[%s3070_s4 + $0x5f0] sm:$0xff]  ;;  %v415_v13 = vld [vmem:[%s3070_s4 + $0x618] sm:$0xff] }
 0x15c   : > { %1403 = vmatprep.mubr.bf16.mxu1 %v743_v23  ;;  %1853 = vmatprep.mubr.bf16.mxu0 %v651_v24  ;;  %v681_v24 = vpack.c.bf16 %v375_v26, %v369_v17  ;;  %v421_v4 = vld [vmem:[%s3070_s4 + $0x648] sm:$0xff] }
 0x15d   : > { %v417_v26 = vld [vmem:[%s3070_s4 + $0x628] sm:$0xff] }
 0x163   : > { %1404 = vmatmul.mubr.bf16.gmra.mrb[92].mxu1 %v742_v37  ;;  %1854 = vmatmul.mubr.bf16.gmra.mrb[28].mxu0 %v650_v8  ;;  %v387_v37 = vld [vmem:[%s3070_s4 + $0x538] sm:$0xff] }
 0x164   : > { %1411 = vmatprep.mubr.bf16.mxu1 %v749_v39  ;;  %1861 = vmatprep.mubr.bf16.mxu0 %v657_v32  ;;  %v772_v39 = vpack.c.bf16 %v562_v25, %v556_v6  ;;  %v687_v10 = vpack.c.bf16 %v387_v37, %v381_v35  ;;  %v427_v35 = vld [vmem:[%s3070_s4 + $0x678] sm:$0xff]  ;;  %v433_v37 = vld [vmem:[%s3070_s4 + $0x6a8] sm:$0xff] }
 0x165   : > { %v709_v44 = vpack.c.bf16 %v433_v37, %v427_v35 }
 0x16b   : > { %1412 = vmatmul.mubr.bf16.gmra.mrb[96].mxu1 %v748_v34  ;;  %1862 = vmatmul.mubr.bf16.gmra.mrb[32].mxu0 %v656_v47  ;;  %v581_v34 = vld [vmem:[%s3070_s4 + $0xb48] sm:$0xff]  ;;  %v587_v47 = vld [vmem:[%s3070_s4 + $0xb78] sm:$0xff] }
 0x16c   : > { %1419 = vmatprep.mubr.bf16.mxu1 %v755_v48  ;;  %1869 = vmatprep.mubr.bf16.mxu0 %v663_v49  ;;  %v393_v49 = vld [vmem:[%s3070_s4 + $0x568] sm:$0xff]  ;;  %v785_v52 = vpack.c.bf16 %v587_v47, %v581_v34  ;;  %v426_v34 = vld [vmem:[%s3070_s4 + $0x670] sm:$0xff]  ;;  %v432_v47 = vld [vmem:[%s3070_s4 + $0x6a0] sm:$0xff] }
 0x16d   : > { %v693_v54 = vpack.c.bf16 %v399_v50, %v393_v49  ;;  %v428_v49 = vld [vmem:[%s3070_s4 + $0x680] sm:$0xff]  ;;  %v434_v50 = vld [vmem:[%s3070_s4 + $0x6b0] sm:$0xff] }
 0x173   : > { %1420 = vmatmul.mubr.bf16.gmra.mrb[100].mxu1 %v754_v38  ;;  %1870 = vmatmul.mubr.bf16.gmra.mrb[36].mxu0 %v662_v14  ;;  %v580_v38 = vld [vmem:[%s3070_s4 + $0xb40] sm:$0xff]  ;;  %v586_v14 = vld [vmem:[%s3070_s4 + $0xb70] sm:$0xff] }
 0x174   : > { %1427 = vmatprep.mubr.bf16.mxu1 %v761_v55  ;;  %1877 = vmatprep.mubr.bf16.mxu0 %v669_v56  ;;  %v392_v55 = vld [vmem:[%s3070_s4 + $0x560] sm:$0xff]  ;;  %v398_v56 = vld [vmem:[%s3070_s4 + $0x590] sm:$0xff]  ;;  %v784_v16 = vpack.c.bf16 %v586_v14, %v580_v38  ;;  %v708_v38 = vpack.c.bf16 %v432_v47, %v426_v34  ;;  %v475_v34 = vld [vmem:[%s3070_s4 + $0x7f8] sm:$0xff] }
 0x175   : > { %v481_v47 = vld [vmem:[%s3070_s4 + $0x828] sm:$0xff] }
 0x17b   : > { %1428 = vmatmul.mubr.bf16.gmra.mrb[104].mxu1 %v760_v1  ;;  %1878 = vmatmul.mubr.bf16.gmra.mrb[40].mxu0 %v668_v2  ;;  %v692_v1 = vpack.c.bf16 %v398_v56, %v392_v55  ;;  %v791_v2 = vpack.c.bf16 %v599_v58, %v593_v57  ;;  %v710_v55 = vpack.c.bf16 %v434_v50, %v428_v49  ;;  %v477_v50 = vld [vmem:[%s3070_s4 + $0x808] sm:$0xff] }
 0x17c   : > { %1435 = vmatprep.mubr.bf16.mxu1 %v767_v3  ;;  %1885 = vmatprep.mubr.bf16.mxu0 %v675_v18  ;;  %v699_v18 = vpack.c.bf16 %v411_v61, %v405_v60  ;;  %v438_v60 = vld [vmem:[%s3070_s4 + $0x6d0] sm:$0xff]  ;;  %v444_v61 = vld [vmem:[%s3070_s4 + $0x700] sm:$0xff] }
 0x17e   : > { %v3434_v15 = vpop.f32.mrb[0].mxu1 }
 0x17f   : > { %v1223_v19 = vpop.f32.mrb[1].mxu1 }
 0x180   : > { %v3438_v21 = vpop.f32.mrb[2].mxu1  ;;  %v423_v19 = vld [vmem:[%s3070_s4 + $0x658] sm:$0xff] }
 0x181   : > { %v1226_v23 = vpop.f32.mrb[3].mxu1  ;;  %v705_v25 = vpack.c.bf16 %v423_v19, %v417_v26 }
 0x182   : > { %v698_v23 = vpack.c.bf16 %v410_v11, %v404_v9  ;;  %v714_v9 = vpack.c.bf16 %v444_v61, %v438_v60  ;;  %v476_v60 = vld [vmem:[%s3070_s4 + $0x800] sm:$0xff]  ;;  %v482_v61 = vld [vmem:[%s3070_s4 + $0x830] sm:$0xff] }
 0x183   : > { %1436 = vmatmul.mubr.bf16.gmra.mrb[108].mxu1 %v766_v20  ;;  %1886 = vmatmul.mubr.bf16.gmra.mrb[44].mxu0 %v674_v22  ;;  %v790_v22 = vpack.c.bf16 %v598_v7, %v592_v5  ;;  %v459_v5 = vld [vmem:[%s3070_s4 + $0x778] sm:$0xff] }
 0x184   : > { %1443 = vmatprep.mubr.bf16.mxu1 %v773_v28  ;;  %1893 = vmatprep.mubr.bf16.mxu0 %v681_v24  ;;  %v703_v24 = vpack.c.bf16 %v421_v4, %v415_v13 }
 0x186   : > { %v3446_v30 = vpop.f32.mrb[4].mxu1 }
 0x187   : > { %v1231_v8 = vpop.f32.mrb[5].mxu1 }
 0x188   : > { %v3450_v32 = vpop.f32.mrb[6].mxu1 }
 0x189   : > { %v1234_v42 = vpop.f32.mrb[7].mxu1 }
 0x18a   : > { %v702_v42 = vpack.c.bf16 %v420_v29, %v414_v27  ;;  %v465_v29 = vld [vmem:[%s3070_s4 + $0x7a8] sm:$0xff] }
 0x18b   : > { %1444 = vmatmul.mubr.bf16.gmra.mrb[112].mxu1 %v772_v39  ;;  %1894 = vmatmul.mubr.bf16.gmra.mrb[48].mxu0 %v680_v40  ;;  %v429_v39 = vld [vmem:[%s3070_s4 + $0x688] sm:$0xff]  ;;  %v435_v40 = vld [vmem:[%s3070_s4 + $0x6b8] sm:$0xff] }
 0x18c   : > { %1451 = vmatprep.mubr.bf16.mxu1 %v779_v41  ;;  %1901 = vmatprep.mubr.bf16.mxu0 %v687_v10  ;;  %v711_v46 = vpack.c.bf16 %v435_v40, %v429_v39 }
 0x18e   : > { %v3458_v48 = vpop.f32.mrb[8].mxu1 }
 0x18f   : > { %v1239_v12 = vpop.f32.mrb[9].mxu1 }
 0x190   : > { %v3462_v51 = vpop.f32.mrb[10].mxu1  ;;  %v439_v12 = vld [vmem:[%s3070_s4 + $0x6d8] sm:$0xff] }
 0x191   : > { %v1242_v53 = vpop.f32.mrb[11].mxu1 }
 0x192   : > { %v447_v53 = vld [vmem:[%s3070_s4 + $0x718] sm:$0xff] }
 0x193   : > { %1452 = vmatmul.mubr.bf16.gmra.mrb[116].mxu1 %v778_v36  ;;  %1902 = vmatmul.mubr.bf16.gmra.mrb[52].mxu0 %v686_v0  ;;  %v445_v36 = vld [vmem:[%s3070_s4 + $0x708] sm:$0xff] }
 0x194   : > { %1459 = vmatprep.mubr.bf16.mxu1 %v785_v52  ;;  %1909 = vmatprep.mubr.bf16.mxu0 %v693_v54  ;;  %v441_v52 = vld [vmem:[%s3070_s4 + $0x6e8] sm:$0xff]  ;;  %v715_v56 = vpack.c.bf16 %v445_v36, %v439_v12  ;;  %v483_v12 = vld [vmem:[%s3070_s4 + $0x838] sm:$0xff] }
 0x195   : > { %v717_v58 = vpack.c.bf16 %v447_v53, %v441_v52 }
 0x196   : > { %v3470_v59 = vpop.f32.mrb[12].mxu1 }
 0x197   : > { %v1247_v62 = vpop.f32.mrb[13].mxu1 }
 0x198   : > { %v3474_v63 = vpop.f32.mrb[14].mxu1  ;;  %v440_v62 = vld [vmem:[%s3070_s4 + $0x6e0] sm:$0xff] }
 0x199   : > { %v1250_v3 = vpop.f32.mrb[15].mxu1 }
 0x19b   : > { %1460 = vmatmul.mubr.bf16.gmra.mrb[120].mxu1 %v784_v16  ;;  %1910 = vmatmul.mubr.bf16.gmra.mrb[56].mxu0 %v692_v1  ;;  %v446_v16 = vld [vmem:[%s3070_s4 + $0x710] sm:$0xff]  ;;  %v451_v1 = vld [vmem:[%s3070_s4 + $0x738] sm:$0xff] }
 0x19c   : > { %1467 = vmatprep.mubr.bf16.mxu1 %v791_v2  ;;  %1917 = vmatprep.mubr.bf16.mxu0 %v699_v18  ;;  %v457_v2 = vld [vmem:[%s3070_s4 + $0x768] sm:$0xff]  ;;  %v716_v13 = vpack.c.bf16 %v446_v16, %v440_v62  ;;  %v487_v62 = vld [vmem:[%s3070_s4 + $0x858] sm:$0xff] }
 0x19d   : > { %v453_v18 = vld [vmem:[%s3070_s4 + $0x748] sm:$0xff]  ;;  %v721_v4 = vpack.c.bf16 %v457_v2, %v451_v1 }
 0x19e   : > { %v3482_v17 = vpop.f32.mrb[16].mxu1  ;;  %v723_v19 = vpack.c.bf16 %v459_v5, %v453_v18  ;;  %v493_v16 = vld [vmem:[%s3070_s4 + $0x888] sm:$0xff]  ;;  %v495_v18 = vld [vmem:[%s3070_s4 + $0x898] sm:$0xff] }
 0x19f   : > { %v1255_v20 = vpop.f32.mrb[17].mxu1  ;;  %v489_v2 = vld [vmem:[%s3070_s4 + $0x868] sm:$0xff] }
 0x1a0   : > { %v3486_v28 = vpop.f32.mrb[18].mxu1  ;;  %v450_v20 = vld [vmem:[%s3070_s4 + $0x730] sm:$0xff] }
 0x1a1   : > { %v1258_v6 = vpop.f32.mrb[19].mxu1 }
 0x1a2   : > { %v463_v6 = vld [vmem:[%s3070_s4 + $0x798] sm:$0xff] }
 0x1a3   : > { %1468 = vmatmul.mubr.bf16.gmra.mrb[124].mxu1 %v790_v22  ;;  %1918 = vmatmul.mubr.bf16.gmra.mrb[60].mxu0 %v698_v23  ;;  %v456_v22 = vld [vmem:[%s3070_s4 + $0x760] sm:$0xff] }
 0x1a4   : > { %1636 = vmatprep.mubr.bf16.mxu1 %v703_v24  ;;  %1925 = vmatprep.mubr.bf16.mxu0 %v705_v25  ;;  %v452_v23 = vld [vmem:[%s3070_s4 + $0x740] sm:$0xff]  ;;  %v458_v24 = vld [vmem:[%s3070_s4 + $0x770] sm:$0xff]  ;;  %v469_v25 = vld [vmem:[%s3070_s4 + $0x7c8] sm:$0xff]  ;;  %v720_v35 = vpack.c.bf16 %v456_v22, %v450_v20 }
 0x1a5   : > { %v722_v39 = vpack.c.bf16 %v458_v24, %v452_v23  ;;  %v727_v40 = vpack.c.bf16 %v469_v25, %v463_v6  ;;  %v486_v20 = vld [vmem:[%s3070_s4 + $0x850] sm:$0xff]  ;;  %v492_v22 = vld [vmem:[%s3070_s4 + $0x880] sm:$0xff]  ;;  %v499_v6 = vld [vmem:[%s3070_s4 + $0x8b8] sm:$0xff] }
 0x1a6   : > { %v3494_v8 = vpop.f32.mrb[20].mxu1  ;;  %v488_v23 = vld [vmem:[%s3070_s4 + $0x860] sm:$0xff]  ;;  %v494_v24 = vld [vmem:[%s3070_s4 + $0x890] sm:$0xff]  ;;  %v505_v25 = vld [vmem:[%s3070_s4 + $0x8e8] sm:$0xff] }
 0x1a7   : > { %v1263_v41 = vpop.f32.mrb[21].mxu1 }
 0x1a8   : > { %v3498_v10 = vpop.f32.mrb[22].mxu1 }
 0x1a9   : > { %v1266_v45 = vpop.f32.mrb[23].mxu1 }
 0x1aa   : > { %v464_v45 = vld [vmem:[%s3070_s4 + $0x7a0] sm:$0xff] }
 0x1ab   : > { %1637 = vmatmul.mubr.bf16.vlgmr.msra.gmra.mrb[64].mxu1 %v702_v42  ;;  %1926 = vmatmul.mubr.bf16.gmra.mrb[64].mxu0 %v704_v43  ;;  %v729_v42 = vpack.c.bf16 %v471_v31, %v465_v29  ;;  %v462_v43 = vld [vmem:[%s3070_s4 + $0x790] sm:$0xff]  ;;  %v501_v31 = vld [vmem:[%s3070_s4 + $0x8c8] sm:$0xff] }
 0x1ac   : > { %1644 = vmatprep.mubr.bf16.mxu1 %v709_v44  ;;  %1933 = vmatprep.mubr.bf16.mxu0 %v711_v46  ;;  %v468_v44 = vld [vmem:[%s3070_s4 + $0x7c0] sm:$0xff]  ;;  %v470_v46 = vld [vmem:[%s3070_s4 + $0x7d0] sm:$0xff] }
 0x1ad   : > { %v726_v52 = vpack.c.bf16 %v468_v44, %v462_v43 }
 0x1ae   : > { %v3506_v0 = vpop.f32.mrb[24].mxu1 }
 0x1af   : > { %v1271_v54 = vpop.f32.mrb[25].mxu1 }
 0x1b0   : > { %v3510_v14 = vpop.f32.mrb[26].mxu1  ;;  %v728_v54 = vpack.c.bf16 %v470_v46, %v464_v45  ;;  %v498_v45 = vld [vmem:[%s3070_s4 + $0x8b0] sm:$0xff]  ;;  %v504_v46 = vld [vmem:[%s3070_s4 + $0x8e0] sm:$0xff] }
 0x1b1   : > { %v1274_v57 = vpop.f32.mrb[27].mxu1 }
 0x1b2   : > { %v474_v57 = vld [vmem:[%s3070_s4 + $0x7f0] sm:$0xff] }
 0x1b3   : > { %1645 = vmatmul.mubr.bf16.gmra.mrb[68].mxu1 %v708_v38  ;;  %1934 = vmatmul.mubr.bf16.gmra.mrb[68].mxu0 %v710_v55  ;;  %v733_v38 = vpack.c.bf16 %v481_v47, %v475_v34  ;;  %v500_v34 = vld [vmem:[%s3070_s4 + $0x8c0] sm:$0xff]  ;;  %v506_v47 = vld [vmem:[%s3070_s4 + $0x8f0] sm:$0xff] }
 0x1b4   : > { %1652 = vmatprep.mubr.bf16.mxu1 %v715_v56  ;;  %1941 = vmatprep.mubr.bf16.mxu0 %v717_v58  ;;  %v735_v56 = vpack.c.bf16 %v483_v12, %v477_v50  ;;  %v480_v58 = vld [vmem:[%s3070_s4 + $0x820] sm:$0xff]  ;;  %v511_v50 = vld [vmem:[%s3070_s4 + $0x918] sm:$0xff]  ;;  %v517_v12 = vld [vmem:[%s3070_s4 + $0x948] sm:$0xff] }
 0x1b6   : > { %v3518_v3 = vpop.f32.mrb[28].mxu1 }
 0x1b7   : > { %v1279_v7 = vpop.f32.mrb[29].mxu1 }
 0x1b8   : > { %v3522_v11 = vpop.f32.mrb[30].mxu1  ;;  %v732_v7 = vpack.c.bf16 %v480_v58, %v474_v57  ;;  %v746_v57 = vpack.c.bf16 %v506_v47, %v500_v34  ;;  %v751_v58 = vpack.c.bf16 %v517_v12, %v511_v50 }
 0x1b9   : > { %v1282_v26 = vpop.f32.mrb[31].mxu1 }
 0x1bb   : > { %1653 = vmatmul.mubr.bf16.gmra.mrb[72].mxu1 %v714_v9  ;;  %1942 = vmatmul.mubr.bf16.gmra.mrb[72].mxu0 %v716_v13  ;;  %v734_v13 = vpack.c.bf16 %v482_v61, %v476_v60 }
 0x1bc   : > { %1660 = vmatprep.mubr.bf16.mxu1 %v721_v4  ;;  %1949 = vmatprep.mubr.bf16.mxu0 %v723_v19  ;;  %v739_v4 = vpack.c.bf16 %v493_v16, %v487_v62  ;;  %v741_v19 = vpack.c.bf16 %v495_v18, %v489_v2  ;;  %v510_v62 = vld [vmem:[%s3070_s4 + $0x910] sm:$0xff]  ;;  %v516_v16 = vld [vmem:[%s3070_s4 + $0x940] sm:$0xff] }
 0x1bd   : > { %v512_v2 = vld [vmem:[%s3070_s4 + $0x920] sm:$0xff]  ;;  %v518_v18 = vld [vmem:[%s3070_s4 + $0x950] sm:$0xff] }
 0x1be   : > { %v3530_v27 = vpop.f32.mrb[32].mxu1 }
 0x1bf   : > { %v1287_v33 = vpop.f32.mrb[33].mxu1 }
 0x1c0   : > { %v3534_v37 = vpop.f32.mrb[34].mxu1  ;;  %v507_v33 = vld [vmem:[%s3070_s4 + $0x8f8] sm:$0xff] }
 0x1c1   : > { %v1290_v41 = vpop.f32.mrb[35].mxu1  ;;  %v747_v44 = vpack.c.bf16 %v507_v33, %v501_v31  ;;  %v522_v31 = vld [vmem:[%s3070_s4 + $0x970] sm:$0xff]  ;;  %v528_v33 = vld [vmem:[%s3070_s4 + $0x9a0] sm:$0xff] }
 0x1c2   : > { %v740_v41 = vpack.c.bf16 %v494_v24, %v488_v23  ;;  %v752_v23 = vpack.c.bf16 %v518_v18, %v512_v2  ;;  %v756_v34 = vpack.c.bf16 %v528_v33, %v522_v31  ;;  %v555_v2 = vld [vmem:[%s3070_s4 + $0xa78] sm:$0xff]  ;;  %v554_v31 = vld [vmem:[%s3070_s4 + $0xa70] sm:$0xff] }
 0x1c3   : > { %1661 = vmatmul.mubr.bf16.gmra.mrb[76].mxu1 %v720_v35  ;;  %1950 = vmatmul.mubr.bf16.gmra.mrb[76].mxu0 %v722_v39  ;;  %v738_v39 = vpack.c.bf16 %v492_v22, %v486_v20  ;;  %v750_v20 = vpack.c.bf16 %v516_v16, %v510_v62  ;;  %v549_v16 = vld [vmem:[%s3070_s4 + $0xa48] sm:$0xff]  ;;  %v559_v33 = vld [vmem:[%s3070_s4 + $0xa98] sm:$0xff] }
 0x1c4   : > { %1668 = vmatprep.mubr.bf16.mxu1 %v727_v40  ;;  %1957 = vmatprep.mubr.bf16.mxu0 %v729_v42  ;;  %v745_v42 = vpack.c.bf16 %v505_v25, %v499_v6 }
 0x1c6   : > { %v3542_v49 = vpop.f32.mrb[36].mxu1 }
 0x1c7   : > { %v1295_v36 = vpop.f32.mrb[37].mxu1 }
 0x1c8   : > { %v3546_v53 = vpop.f32.mrb[38].mxu1 }
 0x1c9   : > { %v1298_v55 = vpop.f32.mrb[39].mxu1 }
 0x1ca   : > { %v744_v55 = vpack.c.bf16 %v504_v46, %v498_v45  ;;  %v543_v45 = vld [vmem:[%s3070_s4 + $0xa18] sm:$0xff] }
 0x1cb   : > { %1669 = vmatmul.mubr.bf16.gmra.mrb[80].mxu1 %v726_v52  ;;  %1958 = vmatmul.mubr.bf16.gmra.mrb[80].mxu0 %v728_v54  ;;  %v513_v52 = vld [vmem:[%s3070_s4 + $0x928] sm:$0xff]  ;;  %v519_v54 = vld [vmem:[%s3070_s4 + $0x958] sm:$0xff] }
 0x1cc   : > { %1676 = vmatprep.mubr.bf16.mxu1 %v733_v38  ;;  %1965 = vmatprep.mubr.bf16.mxu0 %v735_v56  ;;  %v753_v61 = vpack.c.bf16 %v519_v54, %v513_v52 }
 0x1ce   : > { %v3554_v1 = vpop.f32.mrb[40].mxu1 }
 0x1cf   : > { %v1303_v5 = vpop.f32.mrb[41].mxu1 }
 0x1d0   : > { %v3558_v9 = vpop.f32.mrb[42].mxu1  ;;  %v523_v5 = vld [vmem:[%s3070_s4 + $0x978] sm:$0xff] }
 0x1d1   : > { %v1306_v26 = vpop.f32.mrb[43].mxu1 }
 0x1d2   : > { %v531_v26 = vld [vmem:[%s3070_s4 + $0x9b8] sm:$0xff] }
 0x1d3   : > { %1677 = vmatmul.mubr.bf16.gmra.mrb[84].mxu1 %v732_v7  ;;  %1966 = vmatmul.mubr.bf16.gmra.mrb[84].mxu0 %v734_v13  ;;  %v529_v7 = vld [vmem:[%s3070_s4 + $0x9a8] sm:$0xff] }
 0x1d4   : > { %1684 = vmatprep.mubr.bf16.mxu1 %v739_v4  ;;  %1973 = vmatprep.mubr.bf16.mxu0 %v741_v19  ;;  %v525_v4 = vld [vmem:[%s3070_s4 + $0x988] sm:$0xff]  ;;  %v757_v24 = vpack.c.bf16 %v529_v7, %v523_v5 }
 0x1d5   : > { %v759_v25 = vpack.c.bf16 %v531_v26, %v525_v4 }
 0x1d6   : > { %v3566_v29 = vpop.f32.mrb[44].mxu1 }
 0x1d7   : > { %v1311_v35 = vpop.f32.mrb[45].mxu1 }
 0x1d8   : > { %v3570_v40 = vpop.f32.mrb[46].mxu1  ;;  %v524_v35 = vld [vmem:[%s3070_s4 + $0x980] sm:$0xff] }
 0x1d9   : > { %v1314_v43 = vpop.f32.mrb[47].mxu1 }
 0x1db   : > { %1685 = vmatmul.mubr.bf16.gmra.mrb[88].mxu1 %v738_v39  ;;  %1974 = vmatmul.mubr.bf16.gmra.mrb[88].mxu0 %v740_v41  ;;  %v530_v39 = vld [vmem:[%s3070_s4 + $0x9b0] sm:$0xff]  ;;  %v535_v41 = vld [vmem:[%s3070_s4 + $0x9d8] sm:$0xff] }
 0x1dc   : > { %1692 = vmatprep.mubr.bf16.mxu1 %v745_v42  ;;  %1981 = vmatprep.mubr.bf16.mxu0 %v747_v44  ;;  %v541_v42 = vld [vmem:[%s3070_s4 + $0xa08] sm:$0xff]  ;;  %v758_v50 = vpack.c.bf16 %v530_v39, %v524_v35 }
 0x1dd   : > { %v537_v44 = vld [vmem:[%s3070_s4 + $0x9e8] sm:$0xff]  ;;  %v763_v12 = vpack.c.bf16 %v541_v42, %v535_v41  ;;  %v567_v42 = vld [vmem:[%s3070_s4 + $0xad8] sm:$0xff] }
 0x1de   : > { %v3578_v36 = vpop.f32.mrb[48].mxu1  ;;  %v765_v54 = vpack.c.bf16 %v543_v45, %v537_v44  ;;  %v565_v35 = vld [vmem:[%s3070_s4 + $0xac8] sm:$0xff] }
 0x1df   : > { %v1319_v38 = vpop.f32.mrb[49].mxu1  ;;  %v561_v41 = vld [vmem:[%s3070_s4 + $0xaa8] sm:$0xff] }
 0x1e0   : > { %v3582_v56 = vpop.f32.mrb[50].mxu1  ;;  %v534_v38 = vld [vmem:[%s3070_s4 + $0x9d0] sm:$0xff] }
 0x1e1   : > { %v1322_v60 = vpop.f32.mrb[51].mxu1 }
 0x1e2   : > { %v547_v60 = vld [vmem:[%s3070_s4 + $0xa38] sm:$0xff] }
 0x1e3   : > { %1693 = vmatmul.mubr.bf16.gmra.mrb[92].mxu1 %v744_v55  ;;  %1982 = vmatmul.mubr.bf16.gmra.mrb[92].mxu0 %v746_v57  ;;  %v540_v55 = vld [vmem:[%s3070_s4 + $0xa00] sm:$0xff] }
 0x1e4   : > { %1700 = vmatprep.mubr.bf16.mxu1 %v751_v58  ;;  %1989 = vmatprep.mubr.bf16.mxu0 %v753_v61  ;;  %v536_v57 = vld [vmem:[%s3070_s4 + $0x9e0] sm:$0xff]  ;;  %v542_v58 = vld [vmem:[%s3070_s4 + $0xa10] sm:$0xff]  ;;  %v553_v61 = vld [vmem:[%s3070_s4 + $0xa68] sm:$0xff]  ;;  %v762_v5 = vpack.c.bf16 %v540_v55, %v534_v38  ;;  %v777_v38 = vpack.c.bf16 %v567_v42, %v561_v41 }
 0x1e5   : > { %v764_v4 = vpack.c.bf16 %v542_v58, %v536_v57  ;;  %v769_v26 = vpack.c.bf16 %v553_v61, %v547_v60  ;;  %v558_v55 = vld [vmem:[%s3070_s4 + $0xa90] sm:$0xff]  ;;  %v564_v57 = vld [vmem:[%s3070_s4 + $0xac0] sm:$0xff]  ;;  %v571_v61 = vld [vmem:[%s3070_s4 + $0xaf8] sm:$0xff] }
 0x1e6   : > { %v3590_v13 = vpop.f32.mrb[52].mxu1  ;;  %v560_v58 = vld [vmem:[%s3070_s4 + $0xaa0] sm:$0xff]  ;;  %v566_v60 = vld [vmem:[%s3070_s4 + $0xad0] sm:$0xff] }
 0x1e7   : > { %v1327_v19 = vpop.f32.mrb[53].mxu1  ;;  %v572_v41 = vld [vmem:[%s3070_s4 + $0xb00] sm:$0xff]  ;;  %v578_v42 = vld [vmem:[%s3070_s4 + $0xb30] sm:$0xff] }
 0x1e8   : > { %v3594_v22 = vpop.f32.mrb[54].mxu1 }
 0x1e9   : > { %v1330_v6 = vpop.f32.mrb[55].mxu1 }
 0x1ea   : > { %v552_v6 = vld [vmem:[%s3070_s4 + $0xa60] sm:$0xff] }
 0x1eb   : > { %1701 = vmatmul.mubr.bf16.gmra.mrb[96].mxu1 %v750_v20  ;;  %1990 = vmatmul.mubr.bf16.gmra.mrb[96].mxu0 %v752_v23  ;;  %v771_v20 = vpack.c.bf16 %v555_v2, %v549_v16  ;;  %v3620_v23 = vld [vmem:[#allocation7] ss:$0 sm:$0xff]  ;;  %v577_v16 = vld [vmem:[%s3070_s4 + $0xb28] sm:$0xff] }
 0x1ec   : > { %1708 = vmatprep.mubr.bf16.mxu1 %v757_v24  ;;  %1997 = vmatprep.mubr.bf16.mxu0 %v759_v25  ;;  %v546_v24 = vld [vmem:[%s3070_s4 + $0xa30] sm:$0xff]  ;;  %v548_v25 = vld [vmem:[%s3070_s4 + $0xa40] sm:$0xff]  ;;  %v1222_v39 = vadd.f32 %v3620_v23, %v3434_v15  ;;  %v1230_v2 = vadd.f32 %v3620_v23, %v3446_v30 }
 0x1ed   : > { %v768_v45 = vpack.c.bf16 %v552_v6, %v546_v24  ;;  %v776_v6 = vpack.c.bf16 %v566_v60, %v560_v58 }
 0x1ee   : > { %v3602_v43 = vpop.f32.mrb[56].mxu1 }
 0x1ef   : > { %v1335_v46 = vpop.f32.mrb[57].mxu1 }
 0x1f0   : > { %v3606_v47 = vpop.f32.mrb[58].mxu1  ;;  %v1225_v46 = vadd.f32 %v3620_v23, %v3438_v21 }
 0x1f1   : > { %v1338_v52 = vpop.f32.mrb[59].mxu1 }
 0x1f2   : > { %v775_v52 = vpack.c.bf16 %v565_v35, %v559_v33 }
 0x1f3   : > { %1709 = vmatmul.mubr.bf16.gmra.mrb[100].mxu1 %v756_v34  ;;  %1998 = vmatmul.mubr.bf16.gmra.mrb[100].mxu0 %v758_v50 }
 0x1f4   : > { %1716 = vmatprep.mubr.bf16.mxu1 %v763_v12  ;;  %2005 = vmatprep.mubr.bf16.mxu0 %v765_v54  ;;  %v770_v12 = vpack.c.bf16 %v554_v31, %v548_v25  ;;  %v781_v25 = vpack.c.bf16 %v577_v16, %v571_v61  ;;  %v588_v61 = vld [vmem:[%s3070_s4 + $0xb80] sm:$0xff] }
 0x1f5   : > { %v584_v16 = vld [vmem:[%s3070_s4 + $0xb60] sm:$0xff] }
 0x1f6   : > { %v3614_v62 = vpop.f32.mrb[60].mxu1 }
 0x1f7   : > { %v1343_v18 = vpop.f32.mrb[61].mxu1 }
 0x1f8   : > { %v3618_v7 = vpop.f32.mrb[62].mxu1  ;;  %v573_v18 = vld [vmem:[%s3070_s4 + $0xb08] sm:$0xff] }
 0x1f9   : > { %v1346_v19 = vpop.f32.mrb[63].mxu1 }
 0x1fa   : > { %v1233_v19 = vadd.f32 %v3620_v23, %v3450_v32  ;;  %v570_v32 = vld [vmem:[%s3070_s4 + $0xaf0] sm:$0xff] }
 0x1fb   : > { %1717 = vmatmul.mubr.bf16.gmra.mrb[104].mxu1 %v762_v5  ;;  %2006 = vmatmul.mubr.bf16.gmra.mrb[104].mxu0 %v764_v4  ;;  %v579_v5 = vld [vmem:[%s3070_s4 + $0xb38] sm:$0xff] }
 0x1fc   : > { %1724 = vmatprep.mubr.bf16.mxu1 %v769_v26  ;;  %2013 = vmatprep.mubr.bf16.mxu0 %v771_v20  ;;  %v774_v26 = vpack.c.bf16 %v564_v57, %v558_v55  ;;  %v783_v30 = vpack.c.bf16 %v579_v5, %v573_v18  ;;  %v595_v18 = vld [vmem:[%s3070_s4 + $0xbb8] sm:$0xff]  ;;  %v601_v5 = vld [vmem:[%s3070_s4 + $0xbe8] sm:$0xff] }
 0x1fe   : > { %v1799_v44 = vpop.f32.mrb[0].mxu0 }
 0x1ff   : > { %v2324_v34 = vadd.f32 %v1799_v44, %v1222_v39  ;;  %v1801_v50 = vpop.f32.mrb[1].mxu0  ;;  %v576_v39 = vld [vmem:[%s3070_s4 + $0xb20] sm:$0xff]  ;;  %v583_v44 = vld [vmem:[%s3070_s4 + $0xb58] sm:$0xff] }
 0x200   : > { %v1802_v54 = vpop.f32.mrb[2].mxu0  ;;  %v591_v50 = vld [vmem:[%s3070_s4 + $0xb98] sm:$0xff] }
 0x201   : > { %2054 = vst [vmem:[%s3635_s20] sm:$0xff] %v2324_v34  ;;  %v2326_v15 = vadd.f32 %v1802_v54, %v1225_v46  ;;  %v1804_v21 = vpop.f32.mrb[3].mxu0  ;;  %v1238_v46 = vadd.f32 %v3620_v23, %v3458_v48  ;;  %v585_v34 = vld [vmem:[%s3070_s4 + $0xb68] sm:$0xff]  ;;  %v1241_v54 = vadd.f32 %v3620_v23, %v3462_v51  ;;  %v582_v51 = vld [vmem:[%s3070_s4 + $0xb50] sm:$0xff] }
 0x202   : > { %v782_v21 = vpack.c.bf16 %v578_v42, %v572_v41  ;;  %v789_v48 = vpack.c.bf16 %v591_v50, %v585_v34  ;;  %v594_v41 = vld [vmem:[%s3070_s4 + $0xbb0] sm:$0xff]  ;;  %v600_v42 = vld [vmem:[%s3070_s4 + $0xbe0] sm:$0xff]  ;;  %v1257_v50 = vadd.f32 %v3620_v23, %v3486_v28  ;;  %v1265_v28 = vadd.f32 %v3620_v23, %v3498_v10 }
 0x203   : > { %1725 = vmatmul.mubr.bf16.gmra.mrb[108].mxu1 %v768_v45  ;;  %2055 = vst [vmem:[%s3635_s20 + $0x8] sm:$0xff] %v2326_v15  ;;  %2014 = vmatmul.mubr.bf16.gmra.mrb[108].mxu0 %v770_v12  ;;  %v589_v45 = vld [vmem:[%s3070_s4 + $0xb88] sm:$0xff]  ;;  %v792_v34 = vpack.c.bf16 %v600_v42, %v594_v41 }
 0x204   : > { %1732 = vmatprep.mubr.bf16.mxu1 %v775_v52  ;;  %2021 = vmatprep.mubr.bf16.mxu0 %v777_v38  ;;  %v780_v52 = vpack.c.bf16 %v576_v39, %v570_v32  ;;  %v787_v55 = vpack.c.bf16 %v589_v45, %v583_v44  ;;  %v602_v44 = vld [vmem:[%s3070_s4 + $0xbf0] sm:$0xff]  ;;  %v1254_v45 = vadd.f32 %v3620_v23, %v3482_v17 }
 0x205   : > { %v1262_v17 = vadd.f32 %v3620_v23, %v3494_v8  ;;  %v1273_v8 = vadd.f32 %v3620_v23, %v3510_v14 }
 0x206   : > { %v1807_v4 = vpop.f32.mrb[4].mxu0 }
 0x207   : > { %v2328_v20 = vadd.f32 %v1807_v4, %v1230_v2  ;;  %v1809_v24 = vpop.f32.mrb[5].mxu0  ;;  %v590_v2 = vld [vmem:[%s3070_s4 + $0xb90] sm:$0xff]  ;;  %v1246_v4 = vadd.f32 %v3620_v23, %v3470_v59 }
 0x208   : > { %v1810_v31 = vpop.f32.mrb[6].mxu0  ;;  %v786_v24 = vpack.c.bf16 %v588_v61, %v582_v51  ;;  %v1270_v61 = vadd.f32 %v3620_v23, %v3506_v0  ;;  %v1281_v0 = vadd.f32 %v3620_v23, %v3522_v11 }
 0x209   : > { %2056 = vst [vmem:[%s3635_s20 + $0x10] sm:$0xff] %v2328_v20  ;;  %v2330_v33 = vadd.f32 %v1810_v31, %v1233_v19  ;;  %v1812_v35 = vpop.f32.mrb[7].mxu0  ;;  %v603_v19 = vld [vmem:[%s3070_s4 + $0xbf8] sm:$0xff] }
 0x20b   : > { %1733 = vmatmul.mubr.bf16.gmra.mrb[112].mxu1 %v774_v26  ;;  %2057 = vst [vmem:[%s3635_s20 + $0x18] sm:$0xff] %v2330_v33  ;;  %2022 = vmatmul.mubr.bf16.gmra.mrb[112].mxu0 %v776_v6  ;;  %v597_v26 = vld [vmem:[%s3070_s4 + $0xbc8] sm:$0xff]  ;;  %v1249_v6 = vadd.f32 %v3620_v23, %v3474_v63  ;;  %v793_v33 = vpack.c.bf16 %v601_v5, %v595_v18  ;;  %v596_v63 = vld [vmem:[%s3070_s4 + $0xbc0] sm:$0xff] }
 0x20c   : > { %1740 = vmatprep.mubr.bf16.mxu1 %v781_v25  ;;  %2029 = vmatprep.mubr.bf16.mxu0 %v783_v30  ;;  %v788_v30 = vpack.c.bf16 %v590_v2, %v584_v16  ;;  %v795_v32 = vpack.c.bf16 %v603_v19, %v597_v26  ;;  %v1278_v26 = vadd.f32 %v3620_v23, %v3518_v3 }
 0x20d   : > { %v1289_v3 = vadd.f32 %v3620_v23, %v3534_v37 }
 0x20e   : > { %v1815_v12 = vpop.f32.mrb[8].mxu0 }
 0x20f   : > { %v2332_v38 = vadd.f32 %v1815_v12, %v1238_v46  ;;  %v1817_v15 = vpop.f32.mrb[9].mxu0 }
 0x210   : > { %v1818_v57 = vpop.f32.mrb[10].mxu0 }
 0x211   : > { %2058 = vst [vmem:[%s3635_s20 + $0x20] sm:$0xff] %v2332_v38  ;;  %v2334_v58 = vadd.f32 %v1818_v57, %v1241_v54  ;;  %v1820_v60 = vpop.f32.mrb[11].mxu0  ;;  %v794_v54 = vpack.c.bf16 %v602_v44, %v596_v63 }
 0x213   : > { %1741 = vmatmul.mubr.bf16.gmra.mrb[116].mxu1 %v780_v52  ;;  %2059 = vst [vmem:[%s3635_s20 + $0x28] sm:$0xff] %v2334_v58  ;;  %2030 = vmatmul.mubr.bf16.gmra.mrb[116].mxu0 %v782_v21 }
 0x214   : > { %1748 = vmatprep.mubr.bf16.mxu1 %v787_v55  ;;  %2037 = vmatprep.mubr.bf16.mxu0 %v789_v48 }
 0x216   : > { %v1823_v20 = vpop.f32.mrb[12].mxu0 }
 0x217   : > { %v2336_v25 = vadd.f32 %v1823_v20, %v1246_v4  ;;  %v1825_v31 = vpop.f32.mrb[13].mxu0 }
 0x218   : > { %v1826_v35 = vpop.f32.mrb[14].mxu0  ;;  %v1286_v31 = vadd.f32 %v3620_v23, %v3530_v27  ;;  %v1297_v27 = vadd.f32 %v3620_v23, %v3546_v53 }
 0x219   : > { %2060 = vst [vmem:[%s3635_s20 + $0x30] sm:$0xff] %v2336_v25  ;;  %v2338_v59 = vadd.f32 %v1826_v35, %v1249_v6  ;;  %v1828_v39 = vpop.f32.mrb[15].mxu0 }
 0x21a   : > { %v1294_v39 = vadd.f32 %v3620_v23, %v3542_v49  ;;  %v1305_v49 = vadd.f32 %v3620_v23, %v3558_v9 }
 0x21b   : > { %1749 = vmatmul.mubr.bf16.gmra.mrb[120].mxu1 %v786_v24  ;;  %2061 = vst [vmem:[%s3635_s20 + $0x38] sm:$0xff] %v2338_v59  ;;  %2038 = vmatmul.mubr.bf16.gmra.mrb[120].mxu0 %v788_v30 }
 0x21c   : > { %1756 = vmatprep.mubr.bf16.mxu1 %v793_v33  ;;  %2045 = vmatprep.mubr.bf16.mxu0 %v795_v32 }
 0x21e   : > { %v1831_v46 = vpop.f32.mrb[16].mxu0 }
 0x21f   : > { %v2340_v12 = vadd.f32 %v1831_v46, %v1254_v45  ;;  %v1833_v52 = vpop.f32.mrb[17].mxu0  ;;  %v1302_v46 = vadd.f32 %v3620_v23, %v3554_v1  ;;  %v1313_v1 = vadd.f32 %v3620_v23, %v3570_v40 }
 0x220   : > { %v1834_v38 = vpop.f32.mrb[18].mxu0 }
 0x221   : > { %2062 = vst [vmem:[%s3635_s20 + $0x40] sm:$0xff] %v2340_v12  ;;  %v2342_v15 = vadd.f32 %v1834_v38, %v1257_v50  ;;  %v1836_v21 = vpop.f32.mrb[19].mxu0  ;;  %v1310_v38 = vadd.f32 %v3620_v23, %v3566_v29  ;;  %v1321_v29 = vadd.f32 %v3620_v23, %v3582_v56 }
 0x223   : > { %1757 = vmatmul.mubr.bf16.gmra.mrb[124].mxu1 %v792_v34  ;;  %2063 = vst [vmem:[%s3635_s20 + $0x48] sm:$0xff] %v2342_v15  ;;  %2046 = vmatmul.mubr.bf16.gmra.mrb[124].mxu0 %v794_v54 }
 0x226   : > { %v1839_v55 = vpop.f32.mrb[20].mxu0 }
 0x227   : > { %v2344_v57 = vadd.f32 %v1839_v55, %v1262_v17  ;;  %v1841_v48 = vpop.f32.mrb[21].mxu0 }
 0x228   : > { %v1842_v58 = vpop.f32.mrb[22].mxu0 }
 0x229   : > { %2064 = vst [vmem:[%s3635_s20 + $0x50] sm:$0xff] %v2344_v57  ;;  %v2346_v60 = vadd.f32 %v1842_v58, %v1265_v28  ;;  %v1844_v51 = vpop.f32.mrb[23].mxu0  ;;  %v1318_v57 = vadd.f32 %v3620_v23, %v3578_v36  ;;  %v1329_v36 = vadd.f32 %v3620_v23, %v3594_v22 }
 0x22b   : > { %2065 = vst [vmem:[%s3635_s20 + $0x58] sm:$0xff] %v2346_v60 }
 0x22e   : > { %v1847_v16 = vpop.f32.mrb[24].mxu0 }
 0x22f   : > { %v2348_v2 = vadd.f32 %v1847_v16, %v1270_v61  ;;  %v1849_v18 = vpop.f32.mrb[25].mxu0  ;;  %v1326_v16 = vadd.f32 %v3620_v23, %v3590_v13  ;;  %v1337_v13 = vadd.f32 %v3620_v23, %v3606_v47 }
 0x230   : > { %v1850_v10 = vpop.f32.mrb[26].mxu0 }
 0x231   : > { %2066 = vst [vmem:[%s3635_s20 + $0x60] sm:$0xff] %v2348_v2  ;;  %v2350_v5 = vadd.f32 %v1850_v10, %v1273_v8  ;;  %v1852_v4 = vpop.f32.mrb[27].mxu0 }
 0x232   : > { %v1334_v4 = vadd.f32 %v3620_v23, %v3602_v43  ;;  %v1345_v43 = vadd.f32 %v3620_v23, %v3618_v7 }
 0x233   : > { %2067 = vst [vmem:[%s3635_s20 + $0x68] sm:$0xff] %v2350_v5 }
 0x236   : > { %v1855_v19 = vpop.f32.mrb[28].mxu0 }
 0x237   : > { %v2352_v20 = vadd.f32 %v1855_v19, %v1278_v26  ;;  %v1857_v24 = vpop.f32.mrb[29].mxu0 }
 0x238   : > { %v1858_v14 = vpop.f32.mrb[30].mxu0 }
 0x239   : > { %2068 = vst [vmem:[%s3635_s20 + $0x70] sm:$0xff] %v2352_v20  ;;  %v2354_v6 = vadd.f32 %v1858_v14, %v1281_v0  ;;  %v1860_v25 = vpop.f32.mrb[31].mxu0  ;;  %v1342_v14 = vadd.f32 %v3620_v23, %v3614_v62 }
 0x23b   : > { %2069 = vst [vmem:[%s3635_s20 + $0x78] sm:$0xff] %v2354_v6 }
 0x23e   : > { %v1863_v30 = vpop.f32.mrb[32].mxu0 }
 0x23f   : > { %v2356_v33 = vadd.f32 %v1863_v30, %v1286_v31  ;;  %v1865_v35 = vpop.f32.mrb[33].mxu0 }
 0x240   : > { %v1866_v11 = vpop.f32.mrb[34].mxu0 }
 0x241   : > { %2070 = vst [vmem:[%s3635_s20 + $0x80] sm:$0xff] %v2356_v33  ;;  %v2358_v32 = vadd.f32 %v1866_v11, %v1289_v3  ;;  %v1868_v59 = vpop.f32.mrb[35].mxu0 }
 0x243   : > { %2071 = vst [vmem:[%s3635_s20 + $0x88] sm:$0xff] %v2358_v32 }
 0x246   : > { %v1871_v41 = vpop.f32.mrb[36].mxu0 }
 0x247   : > { %v2360_v42 = vadd.f32 %v1871_v41, %v1294_v39  ;;  %v1873_v63 = vpop.f32.mrb[37].mxu0 }
 0x248   : > { %v1874_v37 = vpop.f32.mrb[38].mxu0 }
 0x249   : > { %2072 = vst [vmem:[%s3635_s20 + $0x90] sm:$0xff] %v2360_v42  ;;  %v2362_v44 = vadd.f32 %v1874_v37, %v1297_v27  ;;  %v1876_v45 = vpop.f32.mrb[39].mxu0 }
 0x24b   : > { %2073 = vst [vmem:[%s3635_s20 + $0x98] sm:$0xff] %v2362_v44 }
 0x24e   : > { %v1879_v34 = vpop.f32.mrb[40].mxu0 }
 0x24f   : > { %v2364_v50 = vadd.f32 %v1879_v34, %v1302_v46  ;;  %v1881_v12 = vpop.f32.mrb[41].mxu0 }
 0x250   : > { %v1882_v53 = vpop.f32.mrb[42].mxu0 }
 0x251   : > { %2074 = vst [vmem:[%s3635_s20 + $0xa0] sm:$0xff] %v2364_v50  ;;  %v2366_v52 = vadd.f32 %v1882_v53, %v1305_v49  ;;  %v1884_v54 = vpop.f32.mrb[43].mxu0 }
 0x253   : > { %2075 = vst [vmem:[%s3635_s20 + $0xa8] sm:$0xff] %v2366_v52 }
 0x256   : > { %v1887_v15 = vpop.f32.mrb[44].mxu0 }
 0x257   : > { %v2368_v21 = vadd.f32 %v1887_v15, %v1310_v38  ;;  %v1889_v17 = vpop.f32.mrb[45].mxu0 }
 0x258   : > { %v1890_v9 = vpop.f32.mrb[46].mxu0 }
 0x259   : > { %2076 = vst [vmem:[%s3635_s20 + $0xb0] sm:$0xff] %v2368_v21  ;;  %v2370_v55 = vadd.f32 %v1890_v9, %v1313_v1  ;;  %v1892_v28 = vpop.f32.mrb[47].mxu0 }
 0x25b   : > { %2077 = vst [vmem:[%s3635_s20 + $0xb8] sm:$0xff] %v2370_v55 }
 0x25e   : > { %v1895_v48 = vpop.f32.mrb[48].mxu0 }
 0x25f   : > { %v2372_v58 = vadd.f32 %v1895_v48, %v1318_v57  ;;  %v1897_v60 = vpop.f32.mrb[49].mxu0 }
 0x260   : > { %v1898_v40 = vpop.f32.mrb[50].mxu0 }
 0x261   : > { %2078 = vst [vmem:[%s3635_s20 + $0xc0] sm:$0xff] %v2372_v58  ;;  %v2374_v51 = vadd.f32 %v1898_v40, %v1321_v29  ;;  %v1900_v61 = vpop.f32.mrb[51].mxu0 }
 0x263   : > { %2079 = vst [vmem:[%s3635_s20 + $0xc8] sm:$0xff] %v2374_v51 }
 0x266   : > { %v1903_v8 = vpop.f32.mrb[52].mxu0 }
 0x267   : > { %v2376_v2 = vadd.f32 %v1903_v8, %v1326_v16  ;;  %v1905_v18 = vpop.f32.mrb[53].mxu0 }
 0x268   : > { %v1906_v56 = vpop.f32.mrb[54].mxu0 }
 0x269   : > { %2080 = vst [vmem:[%s3635_s20 + $0xd0] sm:$0xff] %v2376_v2  ;;  %v2378_v10 = vadd.f32 %v1906_v56, %v1329_v36  ;;  %v1908_v5 = vpop.f32.mrb[55].mxu0 }
 0x26b   : > { %2081 = vst [vmem:[%s3635_s20 + $0xd8] sm:$0xff] %v2378_v10 }
 0x26e   : > { %v1911_v26 = vpop.f32.mrb[56].mxu0 }
 0x26f   : > { %v2380_v19 = vadd.f32 %v1911_v26, %v1334_v4  ;;  %v1913_v0 = vpop.f32.mrb[57].mxu0 }
 0x270   : > { %v1914_v22 = vpop.f32.mrb[58].mxu0 }
 0x271   : > { %2082 = vst [vmem:[%s3635_s20 + $0xe0] sm:$0xff] %v2380_v19  ;;  %v2382_v20 = vadd.f32 %v1914_v22, %v1337_v13  ;;  %v1916_v24 = vpop.f32.mrb[59].mxu0 }
 0x273   : > { %2083 = vst [vmem:[%s3635_s20 + $0xe8] sm:$0xff] %v2382_v20 }
 0x276   : > { %v1919_v6 = vpop.f32.mrb[60].mxu0 }
 0x277   : > { %v2384_v25 = vadd.f32 %v1919_v6, %v1342_v14  ;;  %v1921_v31 = vpop.f32.mrb[61].mxu0 }
 0x278   : > { %v1922_v30 = vpop.f32.mrb[62].mxu0 }
 0x279   : > { %2084 = vst [vmem:[%s3635_s20 + $0xf0] sm:$0xff] %v2384_v25  ;;  %v2386_v47 = vadd.f32 %v1922_v30, %v1345_v43  ;;  %v1924_v3 = vpop.f32.mrb[63].mxu0 }
 0x27b   : > { %2085 = vst [vmem:[%s3635_s20 + $0xf8] sm:$0xff] %v2386_v47 }
 0x27e   : > { %v1638_v33 = vpop.f32.mrb[64].mxu1  ;;  %v1927_v11 = vpop.f32.mrb[64].mxu0 }
 0x27f   : > { %v2387_v35 = vadd.f32 %v3620_v23, %v1638_v33  ;;  %v1640_v32 = vpop.f32.mrb[65].mxu1  ;;  %v1929_v59 = vpop.f32.mrb[65].mxu0 }
 0x280   : > { %v1641_v62 = vpop.f32.mrb[66].mxu1  ;;  %v1930_v7 = vpop.f32.mrb[66].mxu0 }
 0x281   : > { %v2388_v39 = vadd.f32 %v2387_v35, %v1927_v11  ;;  %v2389_v41 = vadd.f32 %v3620_v23, %v1641_v62  ;;  %v1643_v27 = vpop.f32.mrb[67].mxu1  ;;  %v1932_v42 = vpop.f32.mrb[67].mxu0 }
 0x283   : > { %2086 = vst [vmem:[%s3635_s20 + $0x100] sm:$0xff] %v2388_v39  ;;  %v2390_v63 = vadd.f32 %v2389_v41, %v1930_v7 }
 0x285   : > { %2087 = vst [vmem:[%s3635_s20 + $0x108] sm:$0xff] %v2390_v63 }
 0x286   : > { %v1646_v37 = vpop.f32.mrb[68].mxu1  ;;  %v1935_v45 = vpop.f32.mrb[68].mxu0 }
 0x287   : > { %v2391_v44 = vadd.f32 %v3620_v23, %v1646_v37  ;;  %v1648_v46 = vpop.f32.mrb[69].mxu1  ;;  %v1937_v34 = vpop.f32.mrb[69].mxu0 }
 0x288   : > { %v1649_v49 = vpop.f32.mrb[70].mxu1  ;;  %v1938_v53 = vpop.f32.mrb[70].mxu0 }
 0x289   : > { %v2392_v50 = vadd.f32 %v2391_v44, %v1935_v45  ;;  %v2393_v12 = vadd.f32 %v3620_v23, %v1649_v49  ;;  %v1651_v52 = vpop.f32.mrb[71].mxu1  ;;  %v1940_v54 = vpop.f32.mrb[71].mxu0 }
 0x28b   : > { %2088 = vst [vmem:[%s3635_s20 + $0x110] sm:$0xff] %v2392_v50  ;;  %v2394_v38 = vadd.f32 %v2393_v12, %v1938_v53 }
 0x28d   : > { %2089 = vst [vmem:[%s3635_s20 + $0x118] sm:$0xff] %v2394_v38 }
 0x28e   : > { %v1654_v15 = vpop.f32.mrb[72].mxu1  ;;  %v1943_v21 = vpop.f32.mrb[72].mxu0 }
 0x28f   : > { %v2395_v1 = vadd.f32 %v3620_v23, %v1654_v15  ;;  %v1656_v17 = vpop.f32.mrb[73].mxu1  ;;  %v1945_v9 = vpop.f32.mrb[73].mxu0 }
 0x290   : > { %v1657_v55 = vpop.f32.mrb[74].mxu1  ;;  %v1946_v48 = vpop.f32.mrb[74].mxu0 }
 0x291   : > { %v2396_v28 = vadd.f32 %v2395_v1, %v1943_v21  ;;  %v2397_v57 = vadd.f32 %v3620_v23, %v1657_v55  ;;  %v1659_v29 = vpop.f32.mrb[75].mxu1  ;;  %v1948_v58 = vpop.f32.mrb[75].mxu0 }
 0x293   : > { %2090 = vst [vmem:[%s3635_s20 + $0x120] sm:$0xff] %v2396_v28  ;;  %v2398_v60 = vadd.f32 %v2397_v57, %v1946_v48 }
 0x295   : > { %2091 = vst [vmem:[%s3635_s20 + $0x128] sm:$0xff] %v2398_v60 }
 0x296   : > { %v1662_v40 = vpop.f32.mrb[76].mxu1  ;;  %v1951_v61 = vpop.f32.mrb[76].mxu0 }
 0x297   : > { %v2399_v51 = vadd.f32 %v3620_v23, %v1662_v40  ;;  %v1664_v16 = vpop.f32.mrb[77].mxu1  ;;  %v1953_v8 = vpop.f32.mrb[77].mxu0 }
 0x298   : > { %v1665_v36 = vpop.f32.mrb[78].mxu1  ;;  %v1954_v56 = vpop.f32.mrb[78].mxu0 }
 0x299   : > { %v2400_v2 = vadd.f32 %v2399_v51, %v1951_v61  ;;  %v2401_v18 = vadd.f32 %v3620_v23, %v1665_v36  ;;  %v1667_v10 = vpop.f32.mrb[79].mxu1  ;;  %v1956_v5 = vpop.f32.mrb[79].mxu0 }
 0x29b   : > { %2092 = vst [vmem:[%s3635_s20 + $0x130] sm:$0xff] %v2400_v2  ;;  %v2402_v4 = vadd.f32 %v2401_v18, %v1954_v56 }
 0x29d   : > { %2093 = vst [vmem:[%s3635_s20 + $0x138] sm:$0xff] %v2402_v4 }
 0x29e   : > { %v1670_v26 = vpop.f32.mrb[80].mxu1  ;;  %v1959_v19 = vpop.f32.mrb[80].mxu0 }
 0x29f   : > { %v2403_v13 = vadd.f32 %v3620_v23, %v1670_v26  ;;  %v1672_v0 = vpop.f32.mrb[81].mxu1  ;;  %v1961_v22 = vpop.f32.mrb[81].mxu0 }
 0x2a0   : > { %v1673_v20 = vpop.f32.mrb[82].mxu1  ;;  %v1962_v6 = vpop.f32.mrb[82].mxu0 }
 0x2a1   : > { %v2404_v24 = vadd.f32 %v2403_v13, %v1959_v19  ;;  %v2405_v14 = vadd.f32 %v3620_v23, %v1673_v20  ;;  %v1675_v43 = vpop.f32.mrb[83].mxu1  ;;  %v1964_v25 = vpop.f32.mrb[83].mxu0 }
 0x2a3   : > { %2094 = vst [vmem:[%s3635_s20 + $0x140] sm:$0xff] %v2404_v24  ;;  %v2406_v31 = vadd.f32 %v2405_v14, %v1962_v6 }
 0x2a5   : > { %2095 = vst [vmem:[%s3635_s20 + $0x148] sm:$0xff] %v2406_v31 }
 0x2a6   : > { %v1678_v30 = vpop.f32.mrb[84].mxu1  ;;  %v1967_v3 = vpop.f32.mrb[84].mxu0 }
 0x2a7   : > { %v2407_v47 = vadd.f32 %v3620_v23, %v1678_v30  ;;  %v1680_v33 = vpop.f32.mrb[85].mxu1  ;;  %v1969_v35 = vpop.f32.mrb[85].mxu0 }
 0x2a8   : > { %v1681_v11 = vpop.f32.mrb[86].mxu1  ;;  %v1970_v62 = vpop.f32.mrb[86].mxu0 }
 0x2a9   : > { %v2408_v32 = vadd.f32 %v2407_v47, %v1967_v3  ;;  %v2409_v59 = vadd.f32 %v3620_v23, %v1681_v11  ;;  %v1683_v39 = vpop.f32.mrb[87].mxu1  ;;  %v1972_v41 = vpop.f32.mrb[87].mxu0 }
 0x2ab   : > { %2096 = vst [vmem:[%s3635_s20 + $0x150] sm:$0xff] %v2408_v32  ;;  %v2410_v7 = vadd.f32 %v2409_v59, %v1970_v62 }
 0x2ad   : > { %2097 = vst [vmem:[%s3635_s20 + $0x158] sm:$0xff] %v2410_v7 }
 0x2ae   : > { %v1686_v27 = vpop.f32.mrb[88].mxu1  ;;  %v1975_v63 = vpop.f32.mrb[88].mxu0 }
 0x2af   : > { %v2411_v42 = vadd.f32 %v3620_v23, %v1686_v27  ;;  %v1688_v37 = vpop.f32.mrb[89].mxu1  ;;  %v1977_v44 = vpop.f32.mrb[89].mxu0 }
 0x2b0   : > { %v1689_v45 = vpop.f32.mrb[90].mxu1  ;;  %v1978_v49 = vpop.f32.mrb[90].mxu0 }
 0x2b1   : > { %v2412_v46 = vadd.f32 %v2411_v42, %v1975_v63  ;;  %v2413_v34 = vadd.f32 %v3620_v23, %v1689_v45  ;;  %v1691_v50 = vpop.f32.mrb[91].mxu1  ;;  %v1980_v12 = vpop.f32.mrb[91].mxu0 }
 0x2b3   : > { %2098 = vst [vmem:[%s3635_s20 + $0x160] sm:$0xff] %v2412_v46  ;;  %v2414_v53 = vadd.f32 %v2413_v34, %v1978_v49 }
 0x2b5   : > { %2099 = vst [vmem:[%s3635_s20 + $0x168] sm:$0xff] %v2414_v53 }
 0x2b6   : > { %v1694_v52 = vpop.f32.mrb[92].mxu1  ;;  %v1983_v38 = vpop.f32.mrb[92].mxu0 }
 0x2b7   : > { %v2415_v54 = vadd.f32 %v3620_v23, %v1694_v52  ;;  %v1696_v15 = vpop.f32.mrb[93].mxu1  ;;  %v1985_v1 = vpop.f32.mrb[93].mxu0 }
 0x2b8   : > { %v1697_v21 = vpop.f32.mrb[94].mxu1  ;;  %v1986_v55 = vpop.f32.mrb[94].mxu0 }
 0x2b9   : > { %v2416_v17 = vadd.f32 %v2415_v54, %v1983_v38  ;;  %v2417_v9 = vadd.f32 %v3620_v23, %v1697_v21  ;;  %v1699_v28 = vpop.f32.mrb[95].mxu1  ;;  %v1988_v57 = vpop.f32.mrb[95].mxu0 }
 0x2bb   : > { %2100 = vst [vmem:[%s3635_s20 + $0x170] sm:$0xff] %v2416_v17  ;;  %v2418_v48 = vadd.f32 %v2417_v9, %v1986_v55 }
 0x2bd   : > { %2101 = vst [vmem:[%s3635_s20 + $0x178] sm:$0xff] %v2418_v48 }
 0x2be   : > { %v1702_v29 = vpop.f32.mrb[96].mxu1  ;;  %v1991_v60 = vpop.f32.mrb[96].mxu0 }
 0x2bf   : > { %v2419_v58 = vadd.f32 %v3620_v23, %v1702_v29  ;;  %v1704_v40 = vpop.f32.mrb[97].mxu1  ;;  %v1993_v51 = vpop.f32.mrb[97].mxu0 }
 0x2c0   : > { %v1705_v61 = vpop.f32.mrb[98].mxu1  ;;  %v1994_v36 = vpop.f32.mrb[98].mxu0 }
 0x2c1   : > { %v2420_v16 = vadd.f32 %v2419_v58, %v1991_v60  ;;  %v2421_v8 = vadd.f32 %v3620_v23, %v1705_v61  ;;  %v1707_v2 = vpop.f32.mrb[99].mxu1  ;;  %v1996_v18 = vpop.f32.mrb[99].mxu0 }
 0x2c3   : > { %2102 = vst [vmem:[%s3635_s20 + $0x180] sm:$0xff] %v2420_v16  ;;  %v2422_v56 = vadd.f32 %v2421_v8, %v1994_v36 }
 0x2c5   : > { %2103 = vst [vmem:[%s3635_s20 + $0x188] sm:$0xff] %v2422_v56 }
 0x2c6   : > { %v1710_v10 = vpop.f32.mrb[100].mxu1  ;;  %v1999_v4 = vpop.f32.mrb[100].mxu0 }
 0x2c7   : > { %v2423_v5 = vadd.f32 %v3620_v23, %v1710_v10  ;;  %v1712_v26 = vpop.f32.mrb[101].mxu1  ;;  %v2001_v13 = vpop.f32.mrb[101].mxu0 }
 0x2c8   : > { %v1713_v19 = vpop.f32.mrb[102].mxu1  ;;  %v2002_v20 = vpop.f32.mrb[102].mxu0 }
 0x2c9   : > { %v2424_v0 = vadd.f32 %v2423_v5, %v1999_v4  ;;  %v2425_v22 = vadd.f32 %v3620_v23, %v1713_v19  ;;  %v1715_v24 = vpop.f32.mrb[103].mxu1  ;;  %v2004_v14 = vpop.f32.mrb[103].mxu0 }
 0x2cb   : > { %2104 = vst [vmem:[%s3635_s20 + $0x190] sm:$0xff] %v2424_v0  ;;  %v2426_v6 = vadd.f32 %v2425_v22, %v2002_v20 }
 0x2cd   : > { %2105 = vst [vmem:[%s3635_s20 + $0x198] sm:$0xff] %v2426_v6 }
 0x2ce   : > { %v1718_v43 = vpop.f32.mrb[104].mxu1  ;;  %v2007_v31 = vpop.f32.mrb[104].mxu0 }
 0x2cf   : > { %v2427_v25 = vadd.f32 %v3620_v23, %v1718_v43  ;;  %v1720_v30 = vpop.f32.mrb[105].mxu1  ;;  %v2009_v47 = vpop.f32.mrb[105].mxu0 }
 0x2d0   : > { %v1721_v3 = vpop.f32.mrb[106].mxu1  ;;  %v2010_v11 = vpop.f32.mrb[106].mxu0 }
 0x2d1   : > { %v2428_v33 = vadd.f32 %v2427_v25, %v2007_v31  ;;  %v2429_v35 = vadd.f32 %v3620_v23, %v1721_v3  ;;  %v1723_v32 = vpop.f32.mrb[107].mxu1  ;;  %v2012_v59 = vpop.f32.mrb[107].mxu0 }
 0x2d3   : > { %2106 = vst [vmem:[%s3635_s20 + $0x1a0] sm:$0xff] %v2428_v33  ;;  %v2430_v62 = vadd.f32 %v2429_v35, %v2010_v11 }
 0x2d5   : > { %2107 = vst [vmem:[%s3635_s20 + $0x1a8] sm:$0xff] %v2430_v62 }
 0x2d6   : > { %v1726_v39 = vpop.f32.mrb[108].mxu1  ;;  %v2015_v7 = vpop.f32.mrb[108].mxu0 }
 0x2d7   : > { %v2431_v41 = vadd.f32 %v3620_v23, %v1726_v39  ;;  %v1728_v27 = vpop.f32.mrb[109].mxu1  ;;  %v2017_v42 = vpop.f32.mrb[109].mxu0 }
 0x2d8   : > { %v1729_v63 = vpop.f32.mrb[110].mxu1  ;;  %v2018_v45 = vpop.f32.mrb[110].mxu0 }
 0x2d9   : > { %v2432_v37 = vadd.f32 %v2431_v41, %v2015_v7  ;;  %v2433_v44 = vadd.f32 %v3620_v23, %v1729_v63  ;;  %v1731_v46 = vpop.f32.mrb[111].mxu1  ;;  %v2020_v34 = vpop.f32.mrb[111].mxu0 }
 0x2db   : > { %2108 = vst [vmem:[%s3635_s20 + $0x1b0] sm:$0xff] %v2432_v37  ;;  %v2434_v49 = vadd.f32 %v2433_v44, %v2018_v45 }
 0x2dd   : > { %2109 = vst [vmem:[%s3635_s20 + $0x1b8] sm:$0xff] %v2434_v49 }
 0x2de   : > { %v1734_v50 = vpop.f32.mrb[112].mxu1  ;;  %v2023_v53 = vpop.f32.mrb[112].mxu0 }
 0x2df   : > { %v2435_v12 = vadd.f32 %v3620_v23, %v1734_v50  ;;  %v1736_v52 = vpop.f32.mrb[113].mxu1  ;;  %v2025_v54 = vpop.f32.mrb[113].mxu0 }
 0x2e0   : > { %v1737_v38 = vpop.f32.mrb[114].mxu1  ;;  %v2026_v21 = vpop.f32.mrb[114].mxu0 }
 0x2e1   : > { %v2436_v15 = vadd.f32 %v2435_v12, %v2023_v53  ;;  %v2437_v1 = vadd.f32 %v3620_v23, %v1737_v38  ;;  %v1739_v17 = vpop.f32.mrb[115].mxu1  ;;  %v2028_v9 = vpop.f32.mrb[115].mxu0 }
 0x2e3   : > { %2110 = vst [vmem:[%s3635_s20 + $0x1c0] sm:$0xff] %v2436_v15  ;;  %v2438_v55 = vadd.f32 %v2437_v1, %v2026_v21 }
 0x2e5   : > { %2111 = vst [vmem:[%s3635_s20 + $0x1c8] sm:$0xff] %v2438_v55 }
 0x2e6   : > { %v1742_v28 = vpop.f32.mrb[116].mxu1  ;;  %v2031_v48 = vpop.f32.mrb[116].mxu0 }
 0x2e7   : > { %v2439_v57 = vadd.f32 %v3620_v23, %v1742_v28  ;;  %v1744_v29 = vpop.f32.mrb[117].mxu1  ;;  %v2033_v58 = vpop.f32.mrb[117].mxu0 }
 0x2e8   : > { %v1745_v60 = vpop.f32.mrb[118].mxu1  ;;  %v2034_v61 = vpop.f32.mrb[118].mxu0 }
 0x2e9   : > { %v2440_v40 = vadd.f32 %v2439_v57, %v2031_v48  ;;  %v2441_v51 = vadd.f32 %v3620_v23, %v1745_v60  ;;  %v1747_v16 = vpop.f32.mrb[119].mxu1  ;;  %v2036_v8 = vpop.f32.mrb[119].mxu0 }
 0x2eb   : > { %2112 = vst [vmem:[%s3635_s20 + $0x1d0] sm:$0xff] %v2440_v40  ;;  %v2442_v36 = vadd.f32 %v2441_v51, %v2034_v61 }
 0x2ed   : > { %2113 = vst [vmem:[%s3635_s20 + $0x1d8] sm:$0xff] %v2442_v36 }
 0x2ee   : > { %v1750_v2 = vpop.f32.mrb[120].mxu1  ;;  %v2039_v56 = vpop.f32.mrb[120].mxu0 }
 0x2ef   : > { %v2443_v18 = vadd.f32 %v3620_v23, %v1750_v2  ;;  %v1752_v10 = vpop.f32.mrb[121].mxu1  ;;  %v2041_v5 = vpop.f32.mrb[121].mxu0 }
 0x2f0   : > { %v1753_v4 = vpop.f32.mrb[122].mxu1  ;;  %v2042_v19 = vpop.f32.mrb[122].mxu0 }
 0x2f1   : > { %v2444_v26 = vadd.f32 %v2443_v18, %v2039_v56  ;;  %v2445_v13 = vadd.f32 %v3620_v23, %v1753_v4  ;;  %v1755_v0 = vpop.f32.mrb[123].mxu1  ;;  %v2044_v22 = vpop.f32.mrb[123].mxu0 }
 0x2f3   : > { %2114 = vst [vmem:[%s3635_s20 + $0x1e0] sm:$0xff] %v2444_v26  ;;  %v2446_v20 = vadd.f32 %v2445_v13, %v2042_v19 }
 0x2f5   : > { %2115 = vst [vmem:[%s3635_s20 + $0x1e8] sm:$0xff] %v2446_v20 }
 0x2f6   : > { %v1758_v24 = vpop.f32.mrb[124].mxu1  ;;  %v2047_v6 = vpop.f32.mrb[124].mxu0 }
 0x2f7   : > { %v2447_v14 = vadd.f32 %v3620_v23, %v1758_v24  ;;  %v1760_v43 = vpop.f32.mrb[125].mxu1  ;;  %v2049_v25 = vpop.f32.mrb[125].mxu0 }
 0x2f8   : > { %v1761_v31 = vpop.f32.mrb[126].mxu1  ;;  %v2050_v3 = vpop.f32.mrb[126].mxu0 }
 0x2f9   : > { %v2448_v30 = vadd.f32 %v2447_v14, %v2047_v6  ;;  %v2449_v47 = vadd.f32 %v3620_v23, %v1761_v31  ;;  %v1763_v33 = vpop.f32.mrb[127].mxu1  ;;  %v2052_v35 = vpop.f32.mrb[127].mxu0 }
 0x2fb   : > { %2116 = vst [vmem:[%s3635_s20 + $0x1f0] sm:$0xff] %v2448_v30  ;;  %v2450_v11 = vadd.f32 %v2449_v47, %v2050_v3 }
 0x2fd   : > { %2117 = vst [vmem:[%s3635_s20 + $0x1f8] sm:$0xff] %v2450_v11 }
 0x2fe   : > { %2803 = shalt.err (!%p2800_p2)
}
 0x2ff   : > { %s2804_s17 = scalar_lea.hbm %s3824_s23, 8192  ;;  %s2808_s29 = scalar_lea.hbm %s3875_s3, 16384 }
 0x300   : > { %p2805_p13 = scmp.ne.s32.totalorder %s3824_s23, %s2804_s17  ;;  %p2809_p4 = scmp.lt.u32.totalorder %s3824_s23, %s3875_s3 }
 0x301   : > { %p2810_p5 = scmp.lt.u32.totalorder %s2808_s29, %s2804_s17  ;;  %p2812_p11 = scmp.lt.u32.totalorder %s2804_s17, %s3824_s23 }
 0x302   : > { %p2806_p6 = pnand %p2805_p13, %p3889_p0 }
 0x303   : > { %p2811_p8 = por %p2810_p5, %p2809_p4 }
 0x304   : > { %p2807_p10 = pneg %p2806_p6 }
 0x305   : > { %p2813_p1 = por %p2812_p11, %p2811_p8 }
 0x307   : > { %p2814_p3 = pnand %p2813_p1, %p2807_p10 }
 0x309   : > { %2817 = shalt.err (!%p2814_p3)
}
 0x30a   : > { %s2871_s18 = smov 128   ;;  %s2872_s20 = smov 8  }
 0x30b   : > { %2592 = dma.vmem_to_hbm [thread:$0]  (%p3889_p0), %s3826_s24, 8192, %s3824_s23, %s2119_s16, %s2871_s18, %s2871_s18, %s2872_s20  }
 0x30c PF: > { %s2147_s11 = sand.u32 1, %s2848_s12   ;;  %p3890_p7 = scmp.ne.s32.totalorder %s3880_s19, 0 }
 0x30d   : > { %p3891_p9 = scmp.ge.s32.totalorder %s2860_s15, 2  ;;  %s2148_s27 = scalar_lea.sflag [#allocation4], %s2147_s11 }
 0x30f   : > { %p2606_p12 = pnand %p3891_p9, %p3890_p7 }
 0x311   : > { %2843 = dma.done.wait (!%p2606_p12), %s2148_s27, 8192  }
 0x312   : > { %2845 = vsyncadd (!%p2606_p12), %s2148_s27, 4294959104  ;;  %p17_p2 = scmp.ge.s32.totalorder %s3004_s5, 4   ;;  %s3892_s12 = smov %s2852_s13 }
 0x313   : > { %s3893_s13 = smov %s2856_s14  ;;  %s3894_s14 = smov %s3020_s8 }
 0x314   : > { %s3895_s15 = smov %s3004_s5  ;;  %19 = sbr.rel (!%p17_p2) target bundleno = 6 (0x6), region = 85 }
 0x31b   :  { %2153 = vsyncpa [#allocation3], 1 }
 0x31c   :  { %2155 = vsyncpa [#allocation3 + $0x1], 1 }
 0x31d   :  { %2156 = vsyncpa [#allocation6], 1 }
 0x31e   :  { %2157 = vsyncpa [#allocation4], 1 }
 0x31f   :  { %2159 = vsyncpa [#allocation4 + $0x1], 1 }

</bundles_post_ra>
